<compile_context>
chip_gen: v7x
topology: tpu7x:2x2x1
jax: 0.10.0
libtpu: 0.0.40
codegen_flags: <defaults>
</compile_context>

<pallas_src>
import math
import functools

import jax
import jax.numpy as jnp
from jax import lax
from jax.experimental import pallas as pl
from jax.experimental.pallas import tpu as pltpu


# ----------------------------------------------------------------------------
# Fused multi-layer encoder kernel.  Grid = (batch_tile, layer); layer inner.
# ----------------------------------------------------------------------------
def fused_encoder_kernel(
    x_ref,        # (TB, S, D) f32   input embeddings (read only at layer 0)
    bias_ref,     # (TB, 1, S) f32   additive padding bias (-1e9 at masked keys)
    wqkv_ref,     # (D, 3D)   bf16   [Wq | Wk | Wv]
    wo_ref,       # (D, D)    bf16   output projection
    vec_ref,      # (5, D)    f32    rows: ln1_g, ln1_b, ln2_g, ln2_b, b2
    b1_ref,       # (1, F)    f32    FFN first bias
    w1_ref,       # (D, F)    bf16
    w2_ref,       # (F, D)    bf16
    y_ref,        # (TB, S, D) f32   final output (written on last layer only)
    att_ref,      # (H, TB, S, S) f32  attention probabilities for this layer
    x_scratch,    # (M, D) f32 VMEM  activation, resident across the layer axis
    o_scratch,    # (M, D) f32 VMEM  per-head attention outputs reassembled
    qh_s,         # (H, M, dh) f32 VMEM
    kh_s,         # (H, M, dh) f32 VMEM
    vh_s,         # (H, M, dh) f32 VMEM
    *,
    num_heads: int,
    scale: float,
):
    layer = pl.program_id(1)
    TB, S, D = x_ref.shape
    H = num_heads
    dh = D // H
    M = TB * S

    # Load the embeddings into the resident activation buffer at layer 0.
    @pl.when(layer == 0)
    def _():
        x_scratch[...] = x_ref[...].reshape(M, D)

    x = x_scratch[...]                                     # (M, D) f32
    x_bf = x.astype(jnp.bfloat16)

    ln1_g = vec_ref[0:1, :]                                # (1, D)
    ln1_b = vec_ref[1:2, :]
    ln2_g = vec_ref[2:3, :]
    ln2_b = vec_ref[3:4, :]
    b2 = vec_ref[4:5, :]
    b1 = b1_ref[...]                                       # (1, F)

    # ---- fused QKV projection: ONE full-width (M,D)x(D,3D) MXU matmul ------
    qkv = jnp.dot(x_bf, wqkv_ref[...],
                  preferred_element_type=jnp.float32)      # (M, 3D) f32

    # ---- head split: static lane slices -> head-batched scratch ------------
    for h in range(H):
        qh_s[h, :, :] = qkv[:, h * dh:(h + 1) * dh] * scale
        kh_s[h, :, :] = qkv[:, D + h * dh:D + (h + 1) * dh]
        vh_s[h, :, :] = qkv[:, 2 * D + h * dh:2 * D + (h + 1) * dh]

    qh = qh_s[...].astype(jnp.bfloat16).reshape(H * TB, S, dh)
    kh = kh_s[...].astype(jnp.bfloat16).reshape(H * TB, S, dh)
    vh = vh_s[...].astype(jnp.bfloat16).reshape(H * TB, S, dh)

    # ---- scores for all (head, batch) pairs: 'bqd,bkd->bqk' ----------------
    s = lax.dot_general(qh, kh, (((2,), (2,)), ((0,), (0,))),
                        preferred_element_type=jnp.float32)      # (H*TB, S, S)
    s = s.reshape(H, TB, S, S) + bias_ref[...][None]             # + (1,TB,1,S)

    # ---- softmax over keys (f32, exact normalization: module output) -------
    m = jnp.max(s, axis=-1, keepdims=True)
    e = jnp.exp(s - m)
    denom = jnp.sum(e, axis=-1, keepdims=True)
    p = e * (1.0 / denom)                                        # (H, TB, S, S)
    att_ref[...] = p                                             # single store

    # ---- attention-weighted values: 'bqk,bkd->bqd' --------------------------
    o = lax.dot_general(p.reshape(H * TB, S, S).astype(jnp.bfloat16), vh,
                        (((2,), (1,)), ((0,), (0,))),
                        preferred_element_type=jnp.float32)      # (H*TB, S, dh)

    # ---- head merge (lanes head-major) then ONE (M,D)x(D,D) out-projection --
    o3 = o.reshape(H, M, dh)
    for h in range(H):
        o_scratch[:, h * dh:(h + 1) * dh] = o3[h]
    att_out = jnp.dot(o_scratch[...].astype(jnp.bfloat16), wo_ref[...],
                      preferred_element_type=jnp.float32)        # (M, D)

    # ---- residual + layernorm 1 (dropout == identity) -----------------------
    h1 = att_out + x
    mu1 = jnp.mean(h1, axis=-1, keepdims=True)
    var1 = jnp.mean((h1 - mu1) ** 2, axis=-1, keepdims=True)
    h1 = (h1 - mu1) * lax.rsqrt(var1 + 1e-12)
    h1 = h1 * ln1_g + ln1_b

    # ---- feed-forward --------------------------------------------------------
    f = jnp.dot(h1.astype(jnp.bfloat16), w1_ref[...],
                preferred_element_type=jnp.float32) + b1
    f = jnp.maximum(f, 0.0)
    f = jnp.dot(f.astype(jnp.bfloat16), w2_ref[...],
                preferred_element_type=jnp.float32) + b2

    # ---- residual + layernorm 2 ---------------------------------------------
    h2 = f + h1
    mu2 = jnp.mean(h2, axis=-1, keepdims=True)
    var2 = jnp.mean((h2 - mu2) ** 2, axis=-1, keepdims=True)
    h2 = (h2 - mu2) * lax.rsqrt(var2 + 1e-12)
    h2 = h2 * ln2_g + ln2_b

    x_scratch[...] = h2                                          # carry to next layer

    @pl.when(layer == pl.num_programs(1) - 1)
    def _():
        y_ref[...] = h2.reshape(TB, S, D).astype(y_ref.dtype)


# ----------------------------------------------------------------------------
# One-time parameter packing (layout + bf16 cast done at load time, not per call)
# ----------------------------------------------------------------------------
def pack_encoder_params(params, num_heads):
    layers = params["layers"]
    mxu_dtype = jnp.bfloat16
    wqkv = jnp.stack([jnp.concatenate([lp["wq"], lp["wk"], lp["wv"]], axis=1)
                      for lp in layers]).astype(mxu_dtype)        # (L, D, 3D)
    wo = jnp.stack([lp["wo"] for lp in layers]).astype(mxu_dtype)  # (L, D, D)
    w1 = jnp.stack([lp["w1"] for lp in layers]).astype(mxu_dtype)  # (L, D, F)
    w2 = jnp.stack([lp["w2"] for lp in layers]).astype(mxu_dtype)  # (L, F, D)
    vecd = jnp.stack([jnp.concatenate(
        [lp["ln1_g"], lp["ln1_b"], lp["ln2_g"], lp["ln2_b"], lp["b2"]], axis=0)
        for lp in layers])                                         # (L, 5, D) f32
    b1 = jnp.stack([lp["b1"] for lp in layers])                    # (L, 1, F) f32
    return dict(embedding=params["embedding"],
                pos_embedding=params["pos_embedding"],
                wqkv=wqkv, wo=wo, w1=w1, w2=w2, vecd=vecd, b1=b1)


def _pick_batch_tile(B, S, target_rows=512):
    """Largest divisor of B keeping TB*S <= target_rows (amortizes weight DMA)."""
    tb = 1
    for cand in range(1, B + 1):
        if B % cand == 0 and cand * S <= max(target_rows, S):
            tb = cand
    return tb


def _vmem_limit_bytes(TB, S, D, F, H):
    bf, f32 = 2, 4
    M = TB * S
    blocks = (M * D * f32 + TB * S * f32 +                 # x, bias
              3 * D * D * bf + D * D * bf +                # wqkv, wo
              5 * D * f32 + F * f32 +                      # vecd, b1
              D * F * bf + F * D * bf +                    # w1, w2
              M * D * f32 + H * M * S * f32)               # y, att
    scratch = 5 * M * D * f32                              # x, o, qh/kh/vh
    live = 3 * H * M * S * f32 + 8 * M * D * f32 + 2 * M * F * f32
    est = 2 * blocks + scratch + live                      # x2: double buffering
    return int(min(100 * 2 ** 20, max(16 * 2 ** 20, (est * 3) // 2)))


# ----------------------------------------------------------------------------
# Wrapper: builds specs and issues a single pallas_call over (batch_tiles, L).
# ----------------------------------------------------------------------------
def encoder_pallas(x_emb, padding_mask, packed, num_heads):
    B, S, D = x_emb.shape
    L = packed["wqkv"].shape[0]
    F = packed["w1"].shape[2]
    H = num_heads
    dh = D // H
    TB = _pick_batch_tile(B, S)
    M = TB * S

    # Additive padding bias: -1e9 at masked (padding) key positions.
    mask_bias = padding_mask.astype(jnp.float32).reshape(B, 1, S) * jnp.float32(-1e9)

    kernel = functools.partial(fused_encoder_kernel,
                               num_heads=H, scale=1.0 / math.sqrt(dh))

    def wspec(*shape):                                     # layer-indexed block
        n0 = len(shape)
        return pl.BlockSpec((None,) + shape, lambda b, l: (l,) + (0,) * n0)

    y, att = pl.pallas_call(
        kernel,
        out_shape=(
            jax.ShapeDtypeStruct((B, S, D), jnp.float32),
            jax.ShapeDtypeStruct((L, H, B, S, S), jnp.float32),
        ),
        grid_spec=pltpu.PrefetchScalarGridSpec(
            num_scalar_prefetch=0,
            grid=(B // TB, L),      # batch tiles outer ("parallel"), layer inner
            in_specs=[
                pl.BlockSpec((TB, S, D), lambda b, l: (b, 0, 0)),   # x embeddings
                pl.BlockSpec((TB, 1, S), lambda b, l: (b, 0, 0)),   # mask bias
                wspec(D, 3 * D),                                    # wqkv
                wspec(D, D),                                        # wo
                wspec(5, D),                                        # packed vectors
                wspec(1, F),                                        # b1
                wspec(D, F),                                        # w1
                wspec(F, D),                                        # w2
            ],
            out_specs=[
                # y stays resident in VMEM across the layer axis, written once.
                pl.BlockSpec((TB, S, D), lambda b, l: (b, 0, 0)),
                pl.BlockSpec((None, H, TB, S, S), lambda b, l: (l, 0, b, 0, 0)),
            ],
            scratch_shapes=[
                pltpu.VMEM((M, D), jnp.float32),        # resident activation
                pltpu.VMEM((M, D), jnp.float32),        # head-merge buffer
                pltpu.VMEM((H, M, dh), jnp.float32),    # q heads
                pltpu.VMEM((H, M, dh), jnp.float32),    # k heads
                pltpu.VMEM((H, M, dh), jnp.float32),    # v heads
            ],
        ),
        compiler_params=pltpu.CompilerParams(
            dimension_semantics=("parallel", "arbitrary"),
            vmem_limit_bytes=_vmem_limit_bytes(TB, S, D, F, H)),
    )(x_emb, mask_bias, packed["wqkv"], packed["wo"], packed["vecd"],
      packed["b1"], packed["w1"], packed["w2"])

    attention = {"encoder_layer" + str(i + 1): jnp.transpose(att[i], (1, 0, 2, 3))
                 for i in range(L)}
    return y, attention


# ----------------------------------------------------------------------------
# Encoder forward (embedding glue in plain JAX, all layers in one Pallas call).
# ----------------------------------------------------------------------------
def encoder_forward(tokens, padding_mask, packed, num_heads):
    """tokens: int32 [B, S]; padding_mask: [B, 1, 1, S] (1 == masked)."""
    B, S = tokens.shape
    x = jnp.take(packed["embedding"], tokens, axis=0)                # [B, S, D]
    x = x + packed["pos_embedding"][:S][None, :, :]                  # positional add
    # TODO(synk): dropout layers are identity (eval mode); training-mode RNG dropout not implemented.
    return encoder_pallas(x, padding_mask, packed, num_heads)


# ----------------------------------------------------------------------------
# Pure-JAX reference (mirrors the PyTorch math) for a correctness check.
# ----------------------------------------------------------------------------
def encoder_layer_ref(x, mask, p, H):
    B, S, D = x.shape
    dh = D // H
    q = x @ p["wq"]
    k = x @ p["wk"]
    v = x @ p["wv"]
    split = lambda t: t.reshape(B, S, H, dh).transpose(0, 2, 1, 3)
    q, k, v = split(q), split(k), split(v)
    s = jnp.einsum("bhqd,bhkd->bhqk", q, k) / math.sqrt(dh)
    s = jnp.where(mask > 0.5, -jnp.inf, s)
    att = jax.nn.softmax(s, axis=-1)
    o = jnp.einsum("bhqk,bhkd->bhqd", att, v).transpose(0, 2, 1, 3).reshape(B, S, D)
    o = o @ p["wo"]

    def ln(t, g, b):
        mu = t.mean(-1, keepdims=True)
        var = ((t - mu) ** 2).mean(-1, keepdims=True)
        return (t - mu) / jnp.sqrt(var + 1e-12) * g + b

    h1 = ln(o + x, p["ln1_g"], p["ln1_b"])
    f = jnp.maximum(h1 @ p["w1"] + p["b1"], 0.0) @ p["w2"] + p["b2"]
    y = ln(f + h1, p["ln2_g"], p["ln2_b"])
    return y, att


def encoder_ref(tokens, padding_mask, params, num_heads):
    S = tokens.shape[1]
    x = jnp.take(params["embedding"], tokens, axis=0)
    x = x + params["pos_embedding"][:S][None, :, :]
    mask_f = padding_mask.astype(jnp.float32)
    atts = {}
    for i, lp in enumerate(params["layers"]):
        x, att = encoder_layer_ref(x, mask_f, lp, num_heads)
        atts["encoder_layer" + str(i + 1)] = att
    return x, atts


# ----------------------------------------------------------------------------
# Deterministic parameter init (shapes per the module's __init__).
# ----------------------------------------------------------------------------
def init_params(key, layers, d_model, d_ff, vocab_size, max_seq_len):
    keys = jax.random.split(key, 2 + layers)
    emb = 0.02 * jax.random.normal(keys[0], (vocab_size, d_model), jnp.float32)
    emb = emb.at[0].set(0.0)                         # padding_idx=0
    pos = 0.02 * jax.random.normal(keys[1], (max_seq_len, d_model), jnp.float32)
    pos = pos.at[0].set(0.0)                         # padding_idx=0 on positional table

    def lin(k, fan_in, fan_out):
        bound = 1.0 / math.sqrt(fan_in)
        return jax.random.uniform(k, (fan_in, fan_out), jnp.float32, -bound, bound)

    layer_params = []
    for i in range(layers):
        lk = jax.random.split(keys[2 + i], 8)
        layer_params.append(dict(
            wq=lin(lk[0], d_model, d_model),
            wk=lin(lk[1], d_model, d_model),
            wv=lin(lk[2], d_model, d_model),
            wo=lin(lk[3], d_model, d_model),
            ln1_g=jnp.ones((1, d_model), jnp.float32),
            ln1_b=jnp.zeros((1, d_model), jnp.float32),
            w1=lin(lk[4], d_model, d_ff),
            b1=jax.random.uniform(lk[5], (1, d_ff), jnp.float32,
                                  -1.0 / math.sqrt(d_model), 1.0 / math.sqrt(d_model)),
            w2=lin(lk[6], d_ff, d_model),
            b2=jax.random.uniform(lk[7], (1, d_model), jnp.float32,
                                  -1.0 / math.sqrt(d_ff), 1.0 / math.sqrt(d_ff)),
            ln2_g=jnp.ones((1, d_model), jnp.float32),
            ln2_b=jnp.zeros((1, d_model), jnp.float32),
        ))
    return dict(embedding=emb, pos_embedding=pos, layers=layer_params)


if __name__ == "__main__":
    # Small config consistent with the module.
    B, S = 2, 8
    D_MODEL, NUM_HEADS, D_FF = 32, 4, 64
    NUM_LAYERS, VOCAB, MAX_SEQ = 2, 50, 16

    key = jax.random.PRNGKey(0)
    pkey, tkey = jax.random.split(key)
    params = init_params(pkey, NUM_LAYERS, D_MODEL, D_FF, VOCAB, MAX_SEQ)
    packed = pack_encoder_params(params, NUM_HEADS)      # one-time weight packing

    # Token ids with some padding (id 0) at the tail of the second sequence.
    tokens = jax.random.randint(tkey, (B, S), 1, VOCAB, dtype=jnp.int32)
    tokens = tokens.at[1, -2:].set(0)
    padding_mask = (tokens == 0).astype(jnp.int32).reshape(B, 1, 1, S)

    y, attention = encoder_forward(tokens, padding_mask, packed, NUM_HEADS)
    y = jax.block_until_ready(y)
    for a in attention.values():
        jax.block_until_ready(a)

    # Sanity-check against a pure-JAX f32 reference (kernel matmuls run in bf16
    # with f32 accumulation, so use a slightly looser tolerance).
    y_ref, att_ref = encoder_ref(tokens, padding_mask, params, NUM_HEADS)
    assert y.shape == (B, S, D_MODEL)
    assert attention["encoder_layer1"].shape == (B, NUM_HEADS, S, S)
    assert jnp.allclose(y, y_ref, atol=2e-2, rtol=2e-2)
    for name in attention:
        assert jnp.allclose(attention[name], att_ref[name], atol=2e-2, rtol=2e-2)

    print("KERNEL_OK")
</pallas_src>

<mosaic_0001>
module attributes {stable_mosaic.version = 11 : i64} {
  func.func @fused_encoder_kernel(%arg0: i32, %arg1: i32, %arg2: memref<2x8x32xf32, #tpu.memory_space<vmem>>, %arg3: memref<2x1x8xf32, #tpu.memory_space<vmem>>, %arg4: memref<1x32x96xbf16, #tpu.memory_space<vmem>>, %arg5: memref<1x32x32xbf16, #tpu.memory_space<vmem>>, %arg6: memref<1x5x32xf32, #tpu.memory_space<vmem>>, %arg7: memref<1x1x64xf32, #tpu.memory_space<vmem>>, %arg8: memref<1x32x64xbf16, #tpu.memory_space<vmem>>, %arg9: memref<1x64x32xbf16, #tpu.memory_space<vmem>>, %arg10: memref<2x8x32xf32, #tpu.memory_space<vmem>>, %arg11: memref<1x4x2x8x8xf32, #tpu.memory_space<vmem>>, %arg12: memref<16x32xf32, #tpu.memory_space<vmem>>, %arg13: memref<16x32xf32, #tpu.memory_space<vmem>>, %arg14: memref<4x16x8xf32, #tpu.memory_space<vmem>>, %arg15: memref<4x16x8xf32, #tpu.memory_space<vmem>>, %arg16: memref<4x16x8xf32, #tpu.memory_space<vmem>>) attributes {dimension_semantics = [#tpu.dimension_semantics<parallel>, #tpu.dimension_semantics<arbitrary>], iteration_bounds = array<i64: 1, 2>, scalar_prefetch = 0 : i64, scratch_operands = 5 : i64, tpu.core_type = #tpu.core_type<tc>, window_params = [{transform_indices = @transform_0, window_bounds = array<i64: 2, 8, 32>}, {transform_indices = @transform_1, window_bounds = array<i64: 2, 1, 8>}, {transform_indices = @transform_2, window_bounds = array<i64: 1, 32, 96>}, {transform_indices = @transform_3, window_bounds = array<i64: 1, 32, 32>}, {transform_indices = @transform_4, window_bounds = array<i64: 1, 5, 32>}, {transform_indices = @transform_5, window_bounds = array<i64: 1, 1, 64>}, {transform_indices = @transform_6, window_bounds = array<i64: 1, 32, 64>}, {transform_indices = @transform_7, window_bounds = array<i64: 1, 64, 32>}, {transform_indices = @transform_8, window_bounds = array<i64: 2, 8, 32>}, {transform_indices = @transform_9, window_bounds = array<i64: 1, 4, 2, 8, 8>}]} {
    %c0_i32 = arith.constant 0 : i32
    %0 = arith.cmpi eq, %arg1, %c0_i32 : i32
    %1 = arith.extui %0 : i1 to i32
    %c0_i32_0 = arith.constant 0 : i32
    %2 = arith.cmpi ne, %1, %c0_i32_0 : i32
    scf.if %2 {
      %c0_114 = arith.constant 0 : index
      %c0_115 = arith.constant 0 : index
      %c0_116 = arith.constant 0 : index
      %190 = vector.load %arg2[%c0_114, %c0_115, %c0_116] : memref<2x8x32xf32, #tpu.memory_space<vmem>>, vector<2x8x32xf32>
      %191 = vector.shape_cast %190 : vector<2x8x32xf32> to vector<16x32xf32>
      %c0_117 = arith.constant 0 : index
      %c0_118 = arith.constant 0 : index
      %192 = vector.load %arg12[%c0_117, %c0_118] : memref<16x32xf32, #tpu.memory_space<vmem>>, vector<16x32xf32>
      tpu.vector_store %arg12[%c0_117, %c0_118], %191 {strides = array<i32>} : memref<16x32xf32, #tpu.memory_space<vmem>>, vector<16x32xf32>,
    } else {
    }
    %c0 = arith.constant 0 : index
    %c0_1 = arith.constant 0 : index
    %3 = vector.load %arg12[%c0, %c0_1] : memref<16x32xf32, #tpu.memory_space<vmem>>, vector<16x32xf32>
    %4 = arith.truncf %3 : vector<16x32xf32> to vector<16x32xbf16>
    %c0_2 = arith.constant 0 : index
    %c0_3 = arith.constant 0 : index
    %c0_4 = arith.constant 0 : index
    %5 = vector.load %arg6[%c0_2, %c0_3, %c0_4] : memref<1x5x32xf32, #tpu.memory_space<vmem>>, vector<1x1x32xf32>
    %6 = vector.shape_cast %5 : vector<1x1x32xf32> to vector<1x32xf32>
    %c0_5 = arith.constant 0 : index
    %c1 = arith.constant 1 : index
    %c0_6 = arith.constant 0 : index
    %7 = vector.load %arg6[%c0_5, %c1, %c0_6] : memref<1x5x32xf32, #tpu.memory_space<vmem>>, vector<1x1x32xf32>
    %8 = vector.shape_cast %7 : vector<1x1x32xf32> to vector<1x32xf32>
    %c0_7 = arith.constant 0 : index
    %c2 = arith.constant 2 : index
    %c0_8 = arith.constant 0 : index
    %9 = vector.load %arg6[%c0_7, %c2, %c0_8] : memref<1x5x32xf32, #tpu.memory_space<vmem>>, vector<1x1x32xf32>
    %10 = vector.shape_cast %9 : vector<1x1x32xf32> to vector<1x32xf32>
    %c0_9 = arith.constant 0 : index
    %c3 = arith.constant 3 : index
    %c0_10 = arith.constant 0 : index
    %11 = vector.load %arg6[%c0_9, %c3, %c0_10] : memref<1x5x32xf32, #tpu.memory_space<vmem>>, vector<1x1x32xf32>
    %12 = vector.shape_cast %11 : vector<1x1x32xf32> to vector<1x32xf32>
    %c0_11 = arith.constant 0 : index
    %c4 = arith.constant 4 : index
    %c0_12 = arith.constant 0 : index
    %13 = vector.load %arg6[%c0_11, %c4, %c0_12] : memref<1x5x32xf32, #tpu.memory_space<vmem>>, vector<1x1x32xf32>
    %14 = vector.shape_cast %13 : vector<1x1x32xf32> to vector<1x32xf32>
    %c0_13 = arith.constant 0 : index
    %c0_14 = arith.constant 0 : index
    %c0_15 = arith.constant 0 : index
    %15 = vector.load %arg7[%c0_13, %c0_14, %c0_15] : memref<1x1x64xf32, #tpu.memory_space<vmem>>, vector<1x1x64xf32>
    %16 = vector.shape_cast %15 : vector<1x1x64xf32> to vector<1x64xf32>
    %c0_16 = arith.constant 0 : index
    %c0_17 = arith.constant 0 : index
    %c0_18 = arith.constant 0 : index
    %17 = vector.load %arg4[%c0_16, %c0_17, %c0_18] : memref<1x32x96xbf16, #tpu.memory_space<vmem>>, vector<1x32x96xbf16>
    %18 = vector.shape_cast %17 : vector<1x32x96xbf16> to vector<32x96xbf16>
    %cst = arith.constant dense<0.000000e+00> : vector<16x96xf32>
    %19 = tpu.matmul %4, %18, %cst {dimension_numbers = #tpu.dot_dimension_numbers<[1], [0], [0], [1], [0, 0, 1, 1], [], []>} : vector<16x32xbf16>, vector<32x96xbf16>, vector<16x96xf32> -> vector<16x96xf32>
    %20 = vector.extract_strided_slice %19 {offsets = [0, 0], sizes = [16, 8], strides = [1, 1]} : vector<16x96xf32> to vector<16x8xf32>
    %cst_19 = arith.constant 0.353553385 : f32
    %21 = vector.broadcast %cst_19 : f32 to vector<16x8xf32>
    %22 = arith.mulf %20, %21 : vector<16x8xf32>
    %c0_20 = arith.constant 0 : index
    %c0_21 = arith.constant 0 : index
    %c0_22 = arith.constant 0 : index
    %23 = vector.load %arg14[%c0_20, %c0_21, %c0_22] : memref<4x16x8xf32, #tpu.memory_space<vmem>>, vector<1x16x8xf32>
    %24 = vector.shape_cast %23 : vector<1x16x8xf32> to vector<16x8xf32>
    %25 = vector.shape_cast %22 : vector<16x8xf32> to vector<1x16x8xf32>
    tpu.vector_store %arg14[%c0_20, %c0_21, %c0_22], %25 {strides = array<i32>} : memref<4x16x8xf32, #tpu.memory_space<vmem>>, vector<1x16x8xf32>,
    %26 = vector.extract_strided_slice %19 {offsets = [0, 32], sizes = [16, 8], strides = [1, 1]} : vector<16x96xf32> to vector<16x8xf32>
    %c0_23 = arith.constant 0 : index
    %c0_24 = arith.constant 0 : index
    %c0_25 = arith.constant 0 : index
    %27 = vector.load %arg15[%c0_23, %c0_24, %c0_25] : memref<4x16x8xf32, #tpu.memory_space<vmem>>, vector<1x16x8xf32>
    %28 = vector.shape_cast %27 : vector<1x16x8xf32> to vector<16x8xf32>
    %29 = vector.shape_cast %26 : vector<16x8xf32> to vector<1x16x8xf32>
    tpu.vector_store %arg15[%c0_23, %c0_24, %c0_25], %29 {strides = array<i32>} : memref<4x16x8xf32, #tpu.memory_space<vmem>>, vector<1x16x8xf32>,
    %30 = vector.extract_strided_slice %19 {offsets = [0, 64], sizes = [16, 8], strides = [1, 1]} : vector<16x96xf32> to vector<16x8xf32>
    %c0_26 = arith.constant 0 : index
    %c0_27 = arith.constant 0 : index
    %c0_28 = arith.constant 0 : index
    %31 = vector.load %arg16[%c0_26, %c0_27, %c0_28] : memref<4x16x8xf32, #tpu.memory_space<vmem>>, vector<1x16x8xf32>
    %32 = vector.shape_cast %31 : vector<1x16x8xf32> to vector<16x8xf32>
    %33 = vector.shape_cast %30 : vector<16x8xf32> to vector<1x16x8xf32>
    tpu.vector_store %arg16[%c0_26, %c0_27, %c0_28], %33 {strides = array<i32>} : memref<4x16x8xf32, #tpu.memory_space<vmem>>, vector<1x16x8xf32>,
    %34 = vector.extract_strided_slice %19 {offsets = [0, 8], sizes = [16, 8], strides = [1, 1]} : vector<16x96xf32> to vector<16x8xf32>
    %cst_29 = arith.constant 0.353553385 : f32
    %35 = vector.broadcast %cst_29 : f32 to vector<16x8xf32>
    %36 = arith.mulf %34, %35 : vector<16x8xf32>
    %c1_30 = arith.constant 1 : index
    %c0_31 = arith.constant 0 : index
    %c0_32 = arith.constant 0 : index
    %37 = vector.load %arg14[%c1_30, %c0_31, %c0_32] : memref<4x16x8xf32, #tpu.memory_space<vmem>>, vector<1x16x8xf32>
    %38 = vector.shape_cast %37 : vector<1x16x8xf32> to vector<16x8xf32>
    %39 = vector.shape_cast %36 : vector<16x8xf32> to vector<1x16x8xf32>
    tpu.vector_store %arg14[%c1_30, %c0_31, %c0_32], %39 {strides = array<i32>} : memref<4x16x8xf32, #tpu.memory_space<vmem>>, vector<1x16x8xf32>,
    %40 = vector.extract_strided_slice %19 {offsets = [0, 40], sizes = [16, 8], strides = [1, 1]} : vector<16x96xf32> to vector<16x8xf32>
    %c1_33 = arith.constant 1 : index
    %c0_34 = arith.constant 0 : index
    %c0_35 = arith.constant 0 : index
    %41 = vector.load %arg15[%c1_33, %c0_34, %c0_35] : memref<4x16x8xf32, #tpu.memory_space<vmem>>, vector<1x16x8xf32>
    %42 = vector.shape_cast %41 : vector<1x16x8xf32> to vector<16x8xf32>
    %43 = vector.shape_cast %40 : vector<16x8xf32> to vector<1x16x8xf32>
    tpu.vector_store %arg15[%c1_33, %c0_34, %c0_35], %43 {strides = array<i32>} : memref<4x16x8xf32, #tpu.memory_space<vmem>>, vector<1x16x8xf32>,
    %44 = vector.extract_strided_slice %19 {offsets = [0, 72], sizes = [16, 8], strides = [1, 1]} : vector<16x96xf32> to vector<16x8xf32>
    %c1_36 = arith.constant 1 : index
    %c0_37 = arith.constant 0 : index
    %c0_38 = arith.constant 0 : index
    %45 = vector.load %arg16[%c1_36, %c0_37, %c0_38] : memref<4x16x8xf32, #tpu.memory_space<vmem>>, vector<1x16x8xf32>
    %46 = vector.shape_cast %45 : vector<1x16x8xf32> to vector<16x8xf32>
    %47 = vector.shape_cast %44 : vector<16x8xf32> to vector<1x16x8xf32>
    tpu.vector_store %arg16[%c1_36, %c0_37, %c0_38], %47 {strides = array<i32>} : memref<4x16x8xf32, #tpu.memory_space<vmem>>, vector<1x16x8xf32>,
    %48 = vector.extract_strided_slice %19 {offsets = [0, 16], sizes = [16, 8], strides = [1, 1]} : vector<16x96xf32> to vector<16x8xf32>
    %cst_39 = arith.constant 0.353553385 : f32
    %49 = vector.broadcast %cst_39 : f32 to vector<16x8xf32>
    %50 = arith.mulf %48, %49 : vector<16x8xf32>
    %c2_40 = arith.constant 2 : index
    %c0_41 = arith.constant 0 : index
    %c0_42 = arith.constant 0 : index
    %51 = vector.load %arg14[%c2_40, %c0_41, %c0_42] : memref<4x16x8xf32, #tpu.memory_space<vmem>>, vector<1x16x8xf32>
    %52 = vector.shape_cast %51 : vector<1x16x8xf32> to vector<16x8xf32>
    %53 = vector.shape_cast %50 : vector<16x8xf32> to vector<1x16x8xf32>
    tpu.vector_store %arg14[%c2_40, %c0_41, %c0_42], %53 {strides = array<i32>} : memref<4x16x8xf32, #tpu.memory_space<vmem>>, vector<1x16x8xf32>,
    %54 = vector.extract_strided_slice %19 {offsets = [0, 48], sizes = [16, 8], strides = [1, 1]} : vector<16x96xf32> to vector<16x8xf32>
    %c2_43 = arith.constant 2 : index
    %c0_44 = arith.constant 0 : index
    %c0_45 = arith.constant 0 : index
    %55 = vector.load %arg15[%c2_43, %c0_44, %c0_45] : memref<4x16x8xf32, #tpu.memory_space<vmem>>, vector<1x16x8xf32>
    %56 = vector.shape_cast %55 : vector<1x16x8xf32> to vector<16x8xf32>
    %57 = vector.shape_cast %54 : vector<16x8xf32> to vector<1x16x8xf32>
    tpu.vector_store %arg15[%c2_43, %c0_44, %c0_45], %57 {strides = array<i32>} : memref<4x16x8xf32, #tpu.memory_space<vmem>>, vector<1x16x8xf32>,
    %58 = vector.extract_strided_slice %19 {offsets = [0, 80], sizes = [16, 8], strides = [1, 1]} : vector<16x96xf32> to vector<16x8xf32>
    %c2_46 = arith.constant 2 : index
    %c0_47 = arith.constant 0 : index
    %c0_48 = arith.constant 0 : index
    %59 = vector.load %arg16[%c2_46, %c0_47, %c0_48] : memref<4x16x8xf32, #tpu.memory_space<vmem>>, vector<1x16x8xf32>
    %60 = vector.shape_cast %59 : vector<1x16x8xf32> to vector<16x8xf32>
    %61 = vector.shape_cast %58 : vector<16x8xf32> to vector<1x16x8xf32>
    tpu.vector_store %arg16[%c2_46, %c0_47, %c0_48], %61 {strides = array<i32>} : memref<4x16x8xf32, #tpu.memory_space<vmem>>, vector<1x16x8xf32>,
    %62 = vector.extract_strided_slice %19 {offsets = [0, 24], sizes = [16, 8], strides = [1, 1]} : vector<16x96xf32> to vector<16x8xf32>
    %cst_49 = arith.constant 0.353553385 : f32
    %63 = vector.broadcast %cst_49 : f32 to vector<16x8xf32>
    %64 = arith.mulf %62, %63 : vector<16x8xf32>
    %c3_50 = arith.constant 3 : index
    %c0_51 = arith.constant 0 : index
    %c0_52 = arith.constant 0 : index
    %65 = vector.load %arg14[%c3_50, %c0_51, %c0_52] : memref<4x16x8xf32, #tpu.memory_space<vmem>>, vector<1x16x8xf32>
    %66 = vector.shape_cast %65 : vector<1x16x8xf32> to vector<16x8xf32>
    %67 = vector.shape_cast %64 : vector<16x8xf32> to vector<1x16x8xf32>
    tpu.vector_store %arg14[%c3_50, %c0_51, %c0_52], %67 {strides = array<i32>} : memref<4x16x8xf32, #tpu.memory_space<vmem>>, vector<1x16x8xf32>,
    %68 = vector.extract_strided_slice %19 {offsets = [0, 56], sizes = [16, 8], strides = [1, 1]} : vector<16x96xf32> to vector<16x8xf32>
    %c3_53 = arith.constant 3 : index
    %c0_54 = arith.constant 0 : index
    %c0_55 = arith.constant 0 : index
    %69 = vector.load %arg15[%c3_53, %c0_54, %c0_55] : memref<4x16x8xf32, #tpu.memory_space<vmem>>, vector<1x16x8xf32>
    %70 = vector.shape_cast %69 : vector<1x16x8xf32> to vector<16x8xf32>
    %71 = vector.shape_cast %68 : vector<16x8xf32> to vector<1x16x8xf32>
    tpu.vector_store %arg15[%c3_53, %c0_54, %c0_55], %71 {strides = array<i32>} : memref<4x16x8xf32, #tpu.memory_space<vmem>>, vector<1x16x8xf32>,
    %72 = vector.extract_strided_slice %19 {offsets = [0, 88], sizes = [16, 8], strides = [1, 1]} : vector<16x96xf32> to vector<16x8xf32>
    %c3_56 = arith.constant 3 : index
    %c0_57 = arith.constant 0 : index
    %c0_58 = arith.constant 0 : index
    %73 = vector.load %arg16[%c3_56, %c0_57, %c0_58] : memref<4x16x8xf32, #tpu.memory_space<vmem>>, vector<1x16x8xf32>
    %74 = vector.shape_cast %73 : vector<1x16x8xf32> to vector<16x8xf32>
    %75 = vector.shape_cast %72 : vector<16x8xf32> to vector<1x16x8xf32>
    tpu.vector_store %arg16[%c3_56, %c0_57, %c0_58], %75 {strides = array<i32>} : memref<4x16x8xf32, #tpu.memory_space<vmem>>, vector<1x16x8xf32>,
    %c0_59 = arith.constant 0 : index
    %c0_60 = arith.constant 0 : index
    %c0_61 = arith.constant 0 : index
    %76 = vector.load %arg14[%c0_59, %c0_60, %c0_61] : memref<4x16x8xf32, #tpu.memory_space<vmem>>, vector<4x16x8xf32>
    %77 = arith.truncf %76 : vector<4x16x8xf32> to vector<4x16x8xbf16>
    %78 = vector.shape_cast %77 : vector<4x16x8xbf16> to vector<8x8x8xbf16>
    %c0_62 = arith.constant 0 : index
    %c0_63 = arith.constant 0 : index
    %c0_64 = arith.constant 0 : index
    %79 = vector.load %arg15[%c0_62, %c0_63, %c0_64] : memref<4x16x8xf32, #tpu.memory_space<vmem>>, vector<4x16x8xf32>
    %80 = arith.truncf %79 : vector<4x16x8xf32> to vector<4x16x8xbf16>
    %81 = vector.shape_cast %80 : vector<4x16x8xbf16> to vector<8x8x8xbf16>
    %c0_65 = arith.constant 0 : index
    %c0_66 = arith.constant 0 : index
    %c0_67 = arith.constant 0 : index
    %82 = vector.load %arg16[%c0_65, %c0_66, %c0_67] : memref<4x16x8xf32, #tpu.memory_space<vmem>>, vector<4x16x8xf32>
    %83 = arith.truncf %82 : vector<4x16x8xf32> to vector<4x16x8xbf16>
    %84 = vector.shape_cast %83 : vector<4x16x8xbf16> to vector<8x8x8xbf16>
    %cst_68 = arith.constant dense<0.000000e+00> : vector<8x8x8xf32>
    %85 = tpu.matmul %78, %81, %cst_68 {dimension_numbers = #tpu.dot_dimension_numbers<[2], [2], [1], [1], [0, 0, 0, 1, 1, 1], [0], [0]>} : vector<8x8x8xbf16>, vector<8x8x8xbf16>, vector<8x8x8xf32> -> vector<8x8x8xf32>
    %86 = vector.shape_cast %85 : vector<8x8x8xf32> to vector<4x2x8x8xf32>
    %c0_69 = arith.constant 0 : index
    %c0_70 = arith.constant 0 : index
    %c0_71 = arith.constant 0 : index
    %87 = vector.load %arg3[%c0_69, %c0_70, %c0_71] : memref<2x1x8xf32, #tpu.memory_space<vmem>>, vector<2x1x8xf32>
    %88 = vector.shape_cast %87 : vector<2x1x8xf32> to vector<1x2x1x8xf32>
    %89 = vector.broadcast %88 : vector<1x2x1x8xf32> to vector<4x2x8x8xf32>
    %90 = arith.addf %86, %89 : vector<4x2x8x8xf32>
    %cst_72 = arith.constant dense<0xFF800000> : vector<4x2x8xf32>
    %91 = vector.multi_reduction <maximumf>, %90, %cst_72 [3] : vector<4x2x8x8xf32> to vector<4x2x8xf32>
    %92 = vector.shape_cast %91 : vector<4x2x8xf32> to vector<4x2x8x1xf32>
    %93 = vector.broadcast %92 : vector<4x2x8x1xf32> to vector<4x2x8x8xf32>
    %94 = arith.subf %90, %93 : vector<4x2x8x8xf32>
    %95 = math.exp %94 : vector<4x2x8x8xf32>
    %cst_73 = arith.constant dense<0.000000e+00> : vector<4x2x8xf32>
    %96 = vector.multi_reduction <add>, %95, %cst_73 [3] : vector<4x2x8x8xf32> to vector<4x2x8xf32>
    %97 = vector.shape_cast %96 : vector<4x2x8xf32> to vector<4x2x8x1xf32>
    %cst_74 = arith.constant 1.000000e+00 : f32
    %98 = vector.broadcast %cst_74 : f32 to vector<4x2x8x1xf32>
    %99 = arith.divf %98, %97 : vector<4x2x8x1xf32>
    %100 = vector.broadcast %99 : vector<4x2x8x1xf32> to vector<4x2x8x8xf32>
    %101 = arith.mulf %95, %100 : vector<4x2x8x8xf32>
    %c0_75 = arith.constant 0 : index
    %c0_76 = arith.constant 0 : index
    %c0_77 = arith.constant 0 : index
    %c0_78 = arith.constant 0 : index
    %c0_79 = arith.constant 0 : index
    %102 = vector.load %arg11[%c0_75, %c0_76, %c0_77, %c0_78, %c0_79] : memref<1x4x2x8x8xf32, #tpu.memory_space<vmem>>, vector<1x4x2x8x8xf32>
    %103 = vector.shape_cast %102 : vector<1x4x2x8x8xf32> to vector<4x2x8x8xf32>
    %104 = vector.shape_cast %101 : vector<4x2x8x8xf32> to vector<1x4x2x8x8xf32>
    tpu.vector_store %arg11[%c0_75, %c0_76, %c0_77, %c0_78, %c0_79], %104 {strides = array<i32>} : memref<1x4x2x8x8xf32, #tpu.memory_space<vmem>>, vector<1x4x2x8x8xf32>,
    %105 = vector.shape_cast %101 : vector<4x2x8x8xf32> to vector<8x8x8xf32>
    %106 = arith.truncf %105 : vector<8x8x8xf32> to vector<8x8x8xbf16>
    %cst_80 = arith.constant dense<0.000000e+00> : vector<8x8x8xf32>
    %107 = tpu.matmul %106, %84, %cst_80 {dimension_numbers = #tpu.dot_dimension_numbers<[2], [1], [1], [2], [0, 0, 0, 1, 1, 2], [0], [0]>} : vector<8x8x8xbf16>, vector<8x8x8xbf16>, vector<8x8x8xf32> -> vector<8x8x8xf32>
    %108 = vector.shape_cast %107 : vector<8x8x8xf32> to vector<4x16x8xf32>
    %109 = vector.extract_strided_slice %108 {offsets = [0, 0, 0], sizes = [1, 16, 8], strides = [1, 1, 1]} : vector<4x16x8xf32> to vector<1x16x8xf32>
    %110 = vector.shape_cast %109 : vector<1x16x8xf32> to vector<16x8xf32>
    %c0_81 = arith.constant 0 : index
    %c0_82 = arith.constant 0 : index
    %111 = vector.load %arg13[%c0_81, %c0_82] : memref<16x32xf32, #tpu.memory_space<vmem>>, vector<16x8xf32>
    tpu.vector_store %arg13[%c0_81, %c0_82], %110 {strides = array<i32>} : memref<16x32xf32, #tpu.memory_space<vmem>>, vector<16x8xf32>,
    %112 = vector.extract_strided_slice %108 {offsets = [1, 0, 0], sizes = [1, 16, 8], strides = [1, 1, 1]} : vector<4x16x8xf32> to vector<1x16x8xf32>
    %113 = vector.shape_cast %112 : vector<1x16x8xf32> to vector<16x8xf32>
    %c0_83 = arith.constant 0 : index
    %c8 = arith.constant 8 : index
    %114 = vector.load %arg13[%c0_83, %c8] : memref<16x32xf32, #tpu.memory_space<vmem>>, vector<16x8xf32>
    tpu.vector_store %arg13[%c0_83, %c8], %113 {strides = array<i32>} : memref<16x32xf32, #tpu.memory_space<vmem>>, vector<16x8xf32>,
    %115 = vector.extract_strided_slice %108 {offsets = [2, 0, 0], sizes = [1, 16, 8], strides = [1, 1, 1]} : vector<4x16x8xf32> to vector<1x16x8xf32>
    %116 = vector.shape_cast %115 : vector<1x16x8xf32> to vector<16x8xf32>
    %c0_84 = arith.constant 0 : index
    %c16 = arith.constant 16 : index
    %117 = vector.load %arg13[%c0_84, %c16] : memref<16x32xf32, #tpu.memory_space<vmem>>, vector<16x8xf32>
    tpu.vector_store %arg13[%c0_84, %c16], %116 {strides = array<i32>} : memref<16x32xf32, #tpu.memory_space<vmem>>, vector<16x8xf32>,
    %118 = vector.extract_strided_slice %108 {offsets = [3, 0, 0], sizes = [1, 16, 8], strides = [1, 1, 1]} : vector<4x16x8xf32> to vector<1x16x8xf32>
    %119 = vector.shape_cast %118 : vector<1x16x8xf32> to vector<16x8xf32>
    %c0_85 = arith.constant 0 : index
    %c24 = arith.constant 24 : index
    %120 = vector.load %arg13[%c0_85, %c24] : memref<16x32xf32, #tpu.memory_space<vmem>>, vector<16x8xf32>
    tpu.vector_store %arg13[%c0_85, %c24], %119 {strides = array<i32>} : memref<16x32xf32, #tpu.memory_space<vmem>>, vector<16x8xf32>,
    %c0_86 = arith.constant 0 : index
    %c0_87 = arith.constant 0 : index
    %121 = vector.load %arg13[%c0_86, %c0_87] : memref<16x32xf32, #tpu.memory_space<vmem>>, vector<16x32xf32>
    %122 = arith.truncf %121 : vector<16x32xf32> to vector<16x32xbf16>
    %c0_88 = arith.constant 0 : index
    %c0_89 = arith.constant 0 : index
    %c0_90 = arith.constant 0 : index
    %123 = vector.load %arg5[%c0_88, %c0_89, %c0_90] : memref<1x32x32xbf16, #tpu.memory_space<vmem>>, vector<1x32x32xbf16>
    %124 = vector.shape_cast %123 : vector<1x32x32xbf16> to vector<32x32xbf16>
    %cst_91 = arith.constant dense<0.000000e+00> : vector<16x32xf32>
    %125 = tpu.matmul %122, %124, %cst_91 {dimension_numbers = #tpu.dot_dimension_numbers<[1], [0], [0], [1], [0, 0, 1, 1], [], []>} : vector<16x32xbf16>, vector<32x32xbf16>, vector<16x32xf32> -> vector<16x32xf32>
    %126 = arith.addf %125, %3 : vector<16x32xf32>
    %cst_92 = arith.constant dense<0.000000e+00> : vector<16xf32>
    %127 = vector.multi_reduction <add>, %126, %cst_92 [1] : vector<16x32xf32> to vector<16xf32>
    %128 = vector.shape_cast %127 : vector<16xf32> to vector<16x1xf32>
    %cst_93 = arith.constant 3.200000e+01 : f32
    %129 = vector.broadcast %cst_93 : f32 to vector<16x1xf32>
    %130 = arith.divf %128, %129 : vector<16x1xf32>
    %131 = vector.broadcast %130 : vector<16x1xf32> to vector<16x32xf32>
    %132 = arith.subf %126, %131 : vector<16x32xf32>
    %133 = arith.mulf %132, %132 : vector<16x32xf32>
    %cst_94 = arith.constant dense<0.000000e+00> : vector<16xf32>
    %134 = vector.multi_reduction <add>, %133, %cst_94 [1] : vector<16x32xf32> to vector<16xf32>
    %135 = vector.shape_cast %134 : vector<16xf32> to vector<16x1xf32>
    %cst_95 = arith.constant 3.200000e+01 : f32
    %136 = vector.broadcast %cst_95 : f32 to vector<16x1xf32>
    %137 = arith.divf %135, %136 : vector<16x1xf32>
    %138 = vector.broadcast %130 : vector<16x1xf32> to vector<16x32xf32>
    %139 = arith.subf %126, %138 : vector<16x32xf32>
    %cst_96 = arith.constant 9.99999996E-13 : f32
    %140 = vector.broadcast %cst_96 : f32 to vector<16x1xf32>
    %141 = arith.addf %137, %140 : vector<16x1xf32>
    %142 = math.rsqrt %141 : vector<16x1xf32>
    %143 = vector.broadcast %142 : vector<16x1xf32> to vector<16x32xf32>
    %144 = arith.mulf %139, %143 : vector<16x32xf32>
    %145 = vector.broadcast %6 : vector<1x32xf32> to vector<16x32xf32>
    %146 = arith.mulf %144, %145 : vector<16x32xf32>
    %147 = vector.broadcast %8 : vector<1x32xf32> to vector<16x32xf32>
    %148 = arith.addf %146, %147 : vector<16x32xf32>
    %149 = arith.truncf %148 : vector<16x32xf32> to vector<16x32xbf16>
    %c0_97 = arith.constant 0 : index
    %c0_98 = arith.constant 0 : index
    %c0_99 = arith.constant 0 : index
    %150 = vector.load %arg8[%c0_97, %c0_98, %c0_99] : memref<1x32x64xbf16, #tpu.memory_space<vmem>>, vector<1x32x64xbf16>
    %151 = vector.shape_cast %150 : vector<1x32x64xbf16> to vector<32x64xbf16>
    %cst_100 = arith.constant dense<0.000000e+00> : vector<16x64xf32>
    %152 = tpu.matmul %149, %151, %cst_100 {dimension_numbers = #tpu.dot_dimension_numbers<[1], [0], [0], [1], [0, 0, 1, 1], [], []>} : vector<16x32xbf16>, vector<32x64xbf16>, vector<16x64xf32> -> vector<16x64xf32>
    %153 = vector.broadcast %16 : vector<1x64xf32> to vector<16x64xf32>
    %154 = arith.addf %152, %153 : vector<16x64xf32>
    %cst_101 = arith.constant 0.000000e+00 : f32
    %155 = vector.broadcast %cst_101 : f32 to vector<16x64xf32>
    %156 = arith.maximumf %154, %155 : vector<16x64xf32>
    %157 = arith.truncf %156 : vector<16x64xf32> to vector<16x64xbf16>
    %c0_102 = arith.constant 0 : index
    %c0_103 = arith.constant 0 : index
    %c0_104 = arith.constant 0 : index
    %158 = vector.load %arg9[%c0_102, %c0_103, %c0_104] : memref<1x64x32xbf16, #tpu.memory_space<vmem>>, vector<1x64x32xbf16>
    %159 = vector.shape_cast %158 : vector<1x64x32xbf16> to vector<64x32xbf16>
    %cst_105 = arith.constant dense<0.000000e+00> : vector<16x32xf32>
    %160 = tpu.matmul %157, %159, %cst_105 {dimension_numbers = #tpu.dot_dimension_numbers<[1], [0], [0], [1], [0, 0, 1, 1], [], []>} : vector<16x64xbf16>, vector<64x32xbf16>, vector<16x32xf32> -> vector<16x32xf32>
    %161 = vector.broadcast %14 : vector<1x32xf32> to vector<16x32xf32>
    %162 = arith.addf %160, %161 : vector<16x32xf32>
    %163 = arith.addf %162, %148 : vector<16x32xf32>
    %cst_106 = arith.constant dense<0.000000e+00> : vector<16xf32>
    %164 = vector.multi_reduction <add>, %163, %cst_106 [1] : vector<16x32xf32> to vector<16xf32>
    %165 = vector.shape_cast %164 : vector<16xf32> to vector<16x1xf32>
    %cst_107 = arith.constant 3.200000e+01 : f32
    %166 = vector.broadcast %cst_107 : f32 to vector<16x1xf32>
    %167 = arith.divf %165, %166 : vector<16x1xf32>
    %168 = vector.broadcast %167 : vector<16x1xf32> to vector<16x32xf32>
    %169 = arith.subf %163, %168 : vector<16x32xf32>
    %170 = arith.mulf %169, %169 : vector<16x32xf32>
    %cst_108 = arith.constant dense<0.000000e+00> : vector<16xf32>
    %171 = vector.multi_reduction <add>, %170, %cst_108 [1] : vector<16x32xf32> to vector<16xf32>
    %172 = vector.shape_cast %171 : vector<16xf32> to vector<16x1xf32>
    %cst_109 = arith.constant 3.200000e+01 : f32
    %173 = vector.broadcast %cst_109 : f32 to vector<16x1xf32>
    %174 = arith.divf %172, %173 : vector<16x1xf32>
    %175 = vector.broadcast %167 : vector<16x1xf32> to vector<16x32xf32>
    %176 = arith.subf %163, %175 : vector<16x32xf32>
    %cst_110 = arith.constant 9.99999996E-13 : f32
    %177 = vector.broadcast %cst_110 : f32 to vector<16x1xf32>
    %178 = arith.addf %174, %177 : vector<16x1xf32>
    %179 = math.rsqrt %178 : vector<16x1xf32>
    %180 = vector.broadcast %179 : vector<16x1xf32> to vector<16x32xf32>
    %181 = arith.mulf %176, %180 : vector<16x32xf32>
    %182 = vector.broadcast %10 : vector<1x32xf32> to vector<16x32xf32>
    %183 = arith.mulf %181, %182 : vector<16x32xf32>
    %184 = vector.broadcast %12 : vector<1x32xf32> to vector<16x32xf32>
    %185 = arith.addf %183, %184 : vector<16x32xf32>
    %c0_111 = arith.constant 0 : index
    %c0_112 = arith.constant 0 : index
    %186 = vector.load %arg12[%c0_111, %c0_112] : memref<16x32xf32, #tpu.memory_space<vmem>>, vector<16x32xf32>
    tpu.vector_store %arg12[%c0_111, %c0_112], %185 {strides = array<i32>} : memref<16x32xf32, #tpu.memory_space<vmem>>, vector<16x32xf32>,
    %c1_i32 = arith.constant 1 : i32
    %187 = arith.cmpi eq, %arg1, %c1_i32 : i32
    %188 = arith.extui %187 : i1 to i32
    %c0_i32_113 = arith.constant 0 : i32
    %189 = arith.cmpi ne, %188, %c0_i32_113 : i32
    scf.if %189 {
      %190 = vector.shape_cast %185 : vector<16x32xf32> to vector<2x8x32xf32>
      %c0_114 = arith.constant 0 : index
      %c0_115 = arith.constant 0 : index
      %c0_116 = arith.constant 0 : index
      %191 = vector.load %arg10[%c0_114, %c0_115, %c0_116] : memref<2x8x32xf32, #tpu.memory_space<vmem>>, vector<2x8x32xf32>
      tpu.vector_store %arg10[%c0_114, %c0_115, %c0_116], %190 {strides = array<i32>} : memref<2x8x32xf32, #tpu.memory_space<vmem>>, vector<2x8x32xf32>,
    } else {
    }
    return
  }
  func.func @transform_0(%arg0: i32, %arg1: i32) -> (i32, i32, i32) {
    %c0_i32 = arith.constant 0 : i32
    %c0_i32_0 = arith.constant 0 : i32
    %c0_i32_1 = arith.constant 0 : i32
    return %arg0, %c0_i32, %c0_i32_0 : i32, i32, i32
  }
  func.func @transform_1(%arg0: i32, %arg1: i32) -> (i32, i32, i32) {
    %c0_i32 = arith.constant 0 : i32
    %c0_i32_0 = arith.constant 0 : i32
    %c0_i32_1 = arith.constant 0 : i32
    return %arg0, %c0_i32, %c0_i32_0 : i32, i32, i32
  }
  func.func @transform_2(%arg0: i32, %arg1: i32) -> (i32, i32, i32) {
    %c0_i32 = arith.constant 0 : i32
    %c0_i32_0 = arith.constant 0 : i32
    %c0_i32_1 = arith.constant 0 : i32
    return %arg1, %c0_i32, %c0_i32_0 : i32, i32, i32
  }
  func.func @transform_3(%arg0: i32, %arg1: i32) -> (i32, i32, i32) {
    %c0_i32 = arith.constant 0 : i32
    %c0_i32_0 = arith.constant 0 : i32
    %c0_i32_1 = arith.constant 0 : i32
    return %arg1, %c0_i32, %c0_i32_0 : i32, i32, i32
  }
  func.func @transform_4(%arg0: i32, %arg1: i32) -> (i32, i32, i32) {
    %c0_i32 = arith.constant 0 : i32
    %c0_i32_0 = arith.constant 0 : i32
    %c0_i32_1 = arith.constant 0 : i32
    return %arg1, %c0_i32, %c0_i32_0 : i32, i32, i32
  }
  func.func @transform_5(%arg0: i32, %arg1: i32) -> (i32, i32, i32) {
    %c0_i32 = arith.constant 0 : i32
    %c0_i32_0 = arith.constant 0 : i32
    %c0_i32_1 = arith.constant 0 : i32
    return %arg1, %c0_i32, %c0_i32_0 : i32, i32, i32
  }
  func.func @transform_6(%arg0: i32, %arg1: i32) -> (i32, i32, i32) {
    %c0_i32 = arith.constant 0 : i32
    %c0_i32_0 = arith.constant 0 : i32
    %c0_i32_1 = arith.constant 0 : i32
    return %arg1, %c0_i32, %c0_i32_0 : i32, i32, i32
  }
  func.func @transform_7(%arg0: i32, %arg1: i32) -> (i32, i32, i32) {
    %c0_i32 = arith.constant 0 : i32
    %c0_i32_0 = arith.constant 0 : i32
    %c0_i32_1 = arith.constant 0 : i32
    return %arg1, %c0_i32, %c0_i32_0 : i32, i32, i32
  }
  func.func @transform_8(%arg0: i32, %arg1: i32) -> (i32, i32, i32) {
    %c0_i32 = arith.constant 0 : i32
    %c0_i32_0 = arith.constant 0 : i32
    %c0_i32_1 = arith.constant 0 : i32
    return %arg0, %c0_i32, %c0_i32_0 : i32, i32, i32
  }
  func.func @transform_9(%arg0: i32, %arg1: i32) -> (i32, i32, i32, i32, i32) {
    %c0_i32 = arith.constant 0 : i32
    %c0_i32_0 = arith.constant 0 : i32
    %c0_i32_1 = arith.constant 0 : i32
    %c0_i32_2 = arith.constant 0 : i32
    return %arg1, %c0_i32, %arg0, %c0_i32_0, %c0_i32_1 : i32, i32, i32, i32, i32
  }
}

</mosaic_0001>

<bundles_post_ra>
// kernel: tpu_custom_call.1
= control target key start
LH: loop header
LB: loop body
LE: loop exit
PB: predicated region body
PF: predicated region fallthrough
CT: control target
= control target key end

     0   :  { %s3247_s0 = inlined_call_operand.vmem [shape: f32[2,8,32], index: 0, kind: input, shape index: {}]   ;;  %s3248_s1 = inlined_call_operand.vmem [shape: f32[2,1,8], index: 1, kind: input, shape index: {}]   ;;  %s3249_s2 = inlined_call_operand.vmem [shape: bf16[2,32,96], index: 2, kind: input, shape index: {}]   ;;  %s3250_s3 = inlined_call_operand.vmem [shape: bf16[2,32,32], index: 3, kind: input, shape index: {}]   ;;  %s3251_s4 = inlined_call_operand.vmem [shape: f32[2,5,32], index: 4, kind: input, shape index: {}]   ;;  %s3252_s5 = inlined_call_operand.vmem [shape: f32[2,1,64], index: 5, kind: input, shape index: {}]   ;;  %s3253_s6 = inlined_call_operand.vmem [shape: bf16[2,32,64], index: 6, kind: input, shape index: {}]   ;;  %s3254_s7 = inlined_call_operand.vmem [shape: bf16[2,64,32], index: 7, kind: input, shape index: {}]   ;;  %s3255_s8 = inlined_call_operand.hbm [shape: f32[2,8,32], index: 8, kind: output, shape index: {0}]   ;;  %s3256_s9 = inlined_call_operand.hbm [shape: f32[2,4,2,8,8], index: 9, kind: output, shape index: {1}]  }
   0x1   :  { %3268 = sst [smem:[#allocation21_spill]] %s3249_s2 }
   0x2   :  { %3269 = sst [smem:[#allocation22_spill]] %s3256_s9 }
   0x3   :  { %15 = vsyncpa [#allocation8], 0 }
   0x4   :  { %16 = vsyncpa [#allocation10], 0 }
   0x5   :  { %18 = vsyncpa [#allocation10 + $0x1], 0  ;;  %s2779_s30 = smov 0   ;;  %s2781_s10 = smov 0  }
   0x6   :  { %s2783_s11 = smov 0   ;;  %s2785_s12 = smov 0  }
   0x7   :  { %s2787_s13 = smov 0   ;;  %s2789_s14 = smov 0  }
   0x8 LB: > { %3270 = sst [smem:[#allocation13_spill]] %s2688_s30  ;;  %s2176_s15 = sadd.s32 4294967295, %s2708_s14   ;;  %s2708_s14 = sphi %s2789_s14, %s24_s14   ;;  %s2704_s13 = sphi %s2787_s13, %s3292_s13   ;;  %s2700_s12 = sphi %s2785_s12, %s3291_s12   ;;  %s2696_s11 = sphi %s2783_s11, %s3290_s11   ;;  %s2692_s10 = sphi %s2781_s10, %s3294_s10   ;;  %s2688_s30 = sphi %s2779_s30, %s3293_s30  }
   0x9   : > { %3271 = sst [smem:[#allocation14_spill]] %s2696_s11  ;;  %s2177_s16 = sadd.s32 4294967294, %s2708_s14  }
   0xa   : > { %3272 = sst [smem:[#allocation15_spill]] %s2704_s13  ;;  %s33_s17 = sadd.s32 1, %s2704_s13 }
   0xb   : > { %3273 = sst [smem:[#allocation16_spill]] %s2708_s14  ;;  %s279_s18 = sadd.s32 1, %s2696_s11 }
   0xc   : > { %p34_p0 = scmp.ge.s32.totalorder %s33_s17, 2  ;;  %p289_p1 = scmp.ne.s32.totalorder %s2696_s11, %s2692_s10 }
   0xd   : > { %p2815_p2 = scmp.eq.s32.totalorder %s2176_s15, 1  ;;  %p295_p3 = scmp.ne.s32.totalorder %s2692_s10, %s2688_s30 }
   0xe   : > { %s3296_s17 = smov (%p34_p0, %s33_s17), 0  ;;  %p296_p5 = scmp.eq.s32.totalorder %s2177_s16, 1 }
   0xf   : > { %3275 = sst [smem:[#allocation17_spill]] %s3296_s17  ;;  %p2825_p4 = por %p2815_p2, %p289_p1 }
  0x10   : > { %s274_s21 = ssub.s32 %s2704_s13, %s3296_s17  ;;  %p2182_p6 = scmp.ge.s32.totalorder %s2708_s14, 1 }
  0x11   : > { %s3276_s20 = scalar_select %p2825_p4, 1, 0 }
  0x12   : > { %p277_p7 = scmp.eq.s32.totalorder %s274_s21, 0  ;;  %p2832_p8 = por %p296_p5, %p295_p3 }
  0x13   : > { %3277 = sst [smem:[#allocation18_spill]] %s3276_s20  ;;  %p376_p9 = scmp.lt.s32.totalorder %s2708_s14, 3 }
  0x14   : > { %s3278_s22 = scalar_select %p2832_p8, 1, 0 }
  0x15   : > { %s2838_s23 = scalar_select %p277_p7, %s2696_s11, %s279_s18  }
  0x16   : > { %3279 = sst [smem:[#allocation19_spill]] %s3278_s22  ;;  %p377_p10 = pnand %p2182_p6, %p376_p9 }
  0x17   : > { %3280 = sst [smem:[#allocation20_spill]] %s2838_s23  ;;  %s3259_s24 = sand.u32 (!%p377_p10), 1, %s2692_s10  }
  0x18   : > { %380 = sbr.rel (%p377_p10) target bundleno = 2681 (0xa79), region = 52  ;;  %p454_p11 = scmp.lt.s32.totalorder (!%p377_p10), %s2700_s12, 1 }
  0x19   : > { %s2183_s25 = sshll.u32 (!%p377_p10), %s3259_s24, 6  ;;  %s3281_s2 = sld [smem:[#allocation21_spill]] (!%p377_p10) }
  0x1a   : > { %s2877_s21 = scalar_lea.vmem (!%p377_p10), [#allocation9], %s2183_s25  ;;  %p2193_p12 = scmp.ne.s32.totalorder (!%p377_p10), %s2700_s12, 0 }
  0x1f   : > { %s2845_s26 = scalar_select %p454_p11, %s2700_s12, 1 }
  0x20   : > { %487 = sbr.rel (%p2193_p12) target bundleno = 39 (0x27), region = 56  ;;  %v488_v0 = vld [vmem:[%s3247_s0] sm:$0xff] (!%p2193_p12)  ;;  %vm490_vm0 = vcmask (!%p2193_p12), 261120   ;;  %v489_v1 = vld [vmem:[%s3247_s0 + $0x8] sm:$0xff] (!%p2193_p12) }
  0x21   : > { %s2264_s27 = sshll.u32 %s2845_s26, 4  ;;  %s2188_s28 = sshll.u32 %s2845_s26, 3  ;;  %491 = vst.msk [vmem:[#allocation2] sm:$0xff] (!%p2193_p12), %vm490_vm0, %v488_v0  ;;  %492 = vst.msk [vmem:[#allocation2 + $0x8] sm:$0xff] (!%p2193_p12), %vm490_vm0, %v489_v1 }
  0x22   : > { %s458_s16 = scalar_lea.vmem %s3281_s2, %s2264_s27  ;;  %s2855_s17 = scalar_lea.vmem %s3250_s3, %s2264_s27 }
  0x23   : > { %s2860_s24 = scalar_lea.vmem %s3251_s4, %s2188_s28  ;;  %s470_s30 = scalar_lea.vmem %s3252_s5, %s2845_s26 }
  0x24   : > { %s2869_s20 = scalar_lea.vmem %s3253_s6, %s2264_s27  ;;  %s2267_s29 = sshll.u32 %s2845_s26, 5 }
  0x25   : > { %s2875_s18 = scalar_lea.vmem %s3254_s7, %s2267_s29 }
  0x27 PF: > { %v2550_v2 = vld [vmem:[%s458_s16] sm:$0xff]   ;;  %v2710_v3 = vmov 0.0   ;;  %v2551_v4 = vld [vmem:[%s458_s16 + $0x8] sm:$0xff]   ;;  %vm2711_vm1 = vmmov 0   ;;  %vm518_vm2 = vcmask 261120   ;;  %vm565_vm3 = vcmask 64512  }
  0x28   : > { %2339 = vmatprep.subr.bf16.mxu0 %v2710_v3  ;;  %2347 = vmatprep.subr.bf16.mxu1 %v2710_v3  ;;  %v2890_v5 = vld [vmem:[#allocation2] sm:$0xff]  ;;  %v2892_v6 = vld [vmem:[#allocation2 + $0x8] sm:$0xff]  ;;  %s2712_s2 = smov 88   ;;  %s2713_s14 = smov 96   ;;  %vm1270_vm4 = vcmask 1043456   ;;  %vm1646_vm5 = vcmask 130112  }
  0x29   : > { %2340 = vmatpush3.bf16.msra.mxu0 %v2550_v2  ;;  %2343 = vmatprep.mubr.msk.bf16.mxu0 %vm2711_vm1, %v2710_v3  ;;  %v495_v7 = vpack.c.bf16 %v2892_v6, %v2890_v5  ;;  %s2714_s22 = smov 80   ;;  %s2715_s25 = smov 120   ;;  %vm1657_vm6 = vcmask 195712   ;;  %vm1668_vm7 = vcmask 261312   ;;  %vm1879_vm8 = vcmask 523264  }
  0x2a   : > { %2341 = vmatprep.subr.bf16.mxu0 %v2710_v3  ;;  %2349 = vmatprep.mubr.msk.bf16.mxu1 %vm2711_vm1, %v2710_v3  ;;  %s2716_s27 = smov 112   ;;  %s2717_s28 = smov 72  }
  0x2b   : > { %s2718_s16 = smov 104   ;;  %s2719_s29 = smov 64  }
  0x2c   : > { %s2720_s9 = smov 56   ;;  %p2256_p13 = scmp.ne.s32.totalorder %s2700_s12, 1 }
  0x2d   : > { %2342 = vmatpush3.bf16.msra.mxu0 %v2551_v4 }
  0x2e   : > { %2353 = vmatprep.subr.bf16.mxu0 %v2710_v3 }
  0x30   : > { %2344 = vmatmul.mubr.msk.bf16.vlgmr.msra.gmra.mrb[0].mxu0 %vm518_vm2, %v495_v7 }
  0x31   : > { %2355 = vmatprep.mubr.msk.bf16.mxu0 %vm2711_vm1, %v2710_v3 }
 0x103   : > { %v2903_v8 = vpop.f32.mrb[0].mxu0 }
 0x104   : > { %597 = vrot.lane.b32.xlu1 %v2903_v8, %s2712_s2  ;;  %570 = vrot.lane.b32.xlu0 %v2903_v8, %s2713_s14  ;;  %v2345_v9 = vpop.f32.mrb[1].mxu0  ;;  %v563_v10 = vmul.f32 0.35355338, %v2903_v8 }
 0x105   : > { %v2908_v11 = vpop.f32.mrb[2].mxu0 }
 0x106   : > { %v2346_v12 = vpop.f32.mrb[3].mxu0  ;;  %566 = vst.msk [vmem:[#allocation4] sm:$0xff] %vm565_vm3, %v563_v10  ;;  %v564_v13 = vmul.f32 0.35355338, %v2908_v11 }
 0x108   : > { %599 = vrot.lane.b32.xlu1 %v2908_v11, %s2712_s2  ;;  %572 = vrot.lane.b32.xlu0 %v2908_v11, %s2713_s14  ;;  %567 = vst.msk [vmem:[#allocation4 + $0x8] sm:$0xff] %vm565_vm3, %v564_v13  ;;  %s2721_s2 = smov 48   ;;  %s2722_s14 = smov 40  }
 0x10c   : > { %626 = vrot.lane.b32.xlu1 %v2908_v11, %s2714_s22  ;;  %624 = vrot.lane.b32.xlu0 %v2903_v8, %s2714_s22  ;;  %s2723_s22 = smov 8  }
 0x10d   : > { %v669_v28 = vld [vmem:[#allocation4] sm:$0xff] }
 0x10e   : > { %v2268_v34 = vpack.c.bf16 %v669_v28, %v669_v28 }
 0x10f   : > { %v670_v35 = vld [vmem:[#allocation4 + $0x8] sm:$0xff] }
 0x110   : > { %588 = vrot.lane.b32.xlu0 %v563_v10, %s2715_s25  ;;  %590 = vrot.lane.b32.xlu1 %v564_v13, %s2715_s25  ;;  %v2269_v41 = vpack.c.bf16 %v670_v35, %v670_v35  ;;  %s2724_s25 = smov 16  }
 0x114   : > { %615 = vrot.lane.b32.xlu0 %v563_v10, %s2716_s27  ;;  %617 = vrot.lane.b32.xlu1 %v564_v13, %s2716_s27  ;;  %s2725_s27 = smov 24  }
 0x118   : > { %651 = vrot.lane.b32.xlu0 %v2903_v8, %s2717_s28  ;;  %653 = vrot.lane.b32.xlu1 %v2908_v11, %s2717_s28 }
 0x11c   : > { %642 = vrot.lane.b32.xlu0 %v563_v10, %s2718_s16  ;;  %644 = vrot.lane.b32.xlu1 %v564_v13, %s2718_s16  ;;  %v2229_v13 = vld [vmem:[%s3248_s1] ss:$0 sm:$0xff] }
 0x120   : > { %578 = vrot.lane.b32.xlu1 %v2903_v8, %s2719_s29 }
 0x176   : > { %v598_v14 = vpop.permute.xlu1 %597  ;;  %v571_v15 = vpop.permute.xlu0 %570 }
 0x177   : > { %604 = vst.msk [vmem:[#allocation5 + $0x10] sm:$0xff] %vm565_vm3, %v598_v14  ;;  %576 = vst.msk [vmem:[#allocation5] sm:$0xff] %vm565_vm3, %v571_v15 }
 0x17a   : > { %v600_v16 = vpop.permute.xlu1 %599  ;;  %v573_v17 = vpop.permute.xlu0 %572 }
 0x17b   : > { %605 = vst.msk [vmem:[#allocation5 + $0x18] sm:$0xff] %vm565_vm3, %v600_v16  ;;  %577 = vst.msk [vmem:[#allocation5 + $0x8] sm:$0xff] %vm565_vm3, %v573_v17 }
 0x17e   : > { %v627_v18 = vpop.permute.xlu1 %626  ;;  %v625_v19 = vpop.permute.xlu0 %624  ;;  %v701_v20 = vld [vmem:[#allocation5] sm:$0xff]  ;;  %v703_v26 = vld [vmem:[#allocation5 + $0x10] sm:$0xff] }
 0x17f   : > { %632 = vst.msk [vmem:[#allocation5 + $0x28] sm:$0xff] %vm565_vm3, %v627_v18  ;;  %631 = vst.msk [vmem:[#allocation5 + $0x20] sm:$0xff] %vm565_vm3, %v625_v19  ;;  %v2276_v21 = vpack.c.bf16 %v701_v20, %v701_v20  ;;  %v2278_v30 = vpack.c.bf16 %v703_v26, %v703_v26  ;;  %v2230_v18 = vld [vmem:[%s3248_s1 + $0x1] ss:$0 sm:$0xff] }
 0x181   : > { %v769_v22 = vsel %vm565_vm3, %v2276_v21, 0  ;;  %v861_v36 = vsel %vm565_vm3, %v2278_v30, 0 }
 0x182   : > { %2348 = vmatpush3.bf16.xpose.msra.mxu1 %v769_v22  ;;  %v589_v23 = vpop.permute.xlu0 %588  ;;  %v591_v24 = vpop.permute.xlu1 %590  ;;  %v702_v25 = vld [vmem:[#allocation5 + $0x8] sm:$0xff]  ;;  %v704_v33 = vld [vmem:[#allocation5 + $0x18] sm:$0xff] }
 0x183   : > { %595 = vst.msk [vmem:[#allocation4 + $0x10] sm:$0xff] %vm565_vm3, %v589_v23  ;;  %596 = vst.msk [vmem:[#allocation4 + $0x18] sm:$0xff] %vm565_vm3, %v591_v24  ;;  %v2277_v27 = vpack.c.bf16 %v702_v25, %v702_v25  ;;  %2359 = vmatprep.subr.bf16.mxu1 %v2710_v3  ;;  %v2279_v37 = vpack.c.bf16 %v704_v33, %v704_v33 }
 0x185   : > { %v815_v29 = vsel %vm565_vm3, %v2277_v27, 0  ;;  %v907_v43 = vsel %vm565_vm3, %v2279_v37, 0 }
 0x186   : > { %2354 = vmatpush3.bf16.xpose.msra.mxu0 %v815_v29  ;;  %v616_v31 = vpop.permute.xlu0 %615  ;;  %v618_v32 = vpop.permute.xlu1 %617  ;;  %v705_v40 = vld [vmem:[#allocation5 + $0x20] sm:$0xff]  ;;  %v706_v47 = vld [vmem:[#allocation5 + $0x28] sm:$0xff] }
 0x187   : > { %622 = vst.msk [vmem:[#allocation4 + $0x20] sm:$0xff] %vm565_vm3, %v616_v31  ;;  %623 = vst.msk [vmem:[#allocation4 + $0x28] sm:$0xff] %vm565_vm3, %v618_v32  ;;  %2365 = vmatprep.subr.bf16.mxu0 %v2710_v3  ;;  %v2280_v44 = vpack.c.bf16 %v705_v40, %v705_v40  ;;  %v2281_v51 = vpack.c.bf16 %v706_v47, %v706_v47 }
 0x189   : > { %2350 = vmatmul.mubr.msk.bf16.vlgmr.msra.gmra.mrb[0].mxu1 %vm565_vm3, %v2268_v34  ;;  %v953_v50 = vsel %vm565_vm3, %v2280_v44, 0  ;;  %v999_v56 = vsel %vm565_vm3, %v2281_v51, 0 }
 0x18a   : > { %2360 = vmatpush3.bf16.xpose.msra.mxu1 %v861_v36  ;;  %v652_v38 = vpop.permute.xlu0 %651  ;;  %v654_v39 = vpop.permute.xlu1 %653  ;;  %2361 = vmatprep.mubr.msk.bf16.mxu1 %vm2711_vm1, %v2710_v3  ;;  %v671_v42 = vld [vmem:[#allocation4 + $0x10] sm:$0xff]  ;;  %v672_v49 = vld [vmem:[#allocation4 + $0x18] sm:$0xff] }
 0x18b   : > { %658 = vst.msk [vmem:[#allocation5 + $0x30] sm:$0xff] %vm565_vm3, %v652_v38  ;;  %659 = vst.msk [vmem:[#allocation5 + $0x38] sm:$0xff] %vm565_vm3, %v654_v39  ;;  %2371 = vmatprep.subr.bf16.mxu1 %v2710_v3  ;;  %v2270_v48 = vpack.c.bf16 %v671_v42, %v671_v42  ;;  %v2271_v54 = vpack.c.bf16 %v672_v49, %v672_v49 }
 0x18d   : > { %2356 = vmatmul.mubr.msk.bf16.vlgmr.msra.gmra.mrb[4].mxu0 %vm565_vm3, %v2269_v41 }
 0x18e   : > { %v643_v45 = vpop.permute.xlu0 %642  ;;  %v645_v46 = vpop.permute.xlu1 %644  ;;  %2366 = vmatpush3.bf16.xpose.msra.mxu0 %v907_v43  ;;  %2367 = vmatprep.mubr.msk.bf16.mxu0 %vm2711_vm1, %v2710_v3  ;;  %v673_v55 = vld [vmem:[#allocation4 + $0x20] sm:$0xff]  ;;  %v674_v60 = vld [vmem:[#allocation4 + $0x28] sm:$0xff] }
 0x18f   : > { %649 = vst.msk [vmem:[#allocation4 + $0x30] sm:$0xff] %vm565_vm3, %v643_v45  ;;  %650 = vst.msk [vmem:[#allocation4 + $0x38] sm:$0xff] %vm565_vm3, %v645_v46  ;;  %2377 = vmatprep.subr.bf16.mxu0 %v2710_v3  ;;  %v2272_v59 = vpack.c.bf16 %v673_v55, %v673_v55  ;;  %v2273_v0 = vpack.c.bf16 %v674_v60, %v674_v60 }
 0x191   : > { %2362 = vmatmul.mubr.msk.bf16.vlgmr.msra.gmra.mrb[4].mxu1 %vm565_vm3, %v2270_v48 }
 0x192   : > { %2372 = vmatpush3.bf16.xpose.msra.mxu1 %v953_v50  ;;  %v579_v52 = vpop.permute.xlu1 %578  ;;  %2373 = vmatprep.mubr.msk.bf16.mxu1 %vm2711_vm1, %v2710_v3  ;;  %v707_v53 = vld [vmem:[#allocation5 + $0x30] sm:$0xff]  ;;  %v708_v58 = vld [vmem:[#allocation5 + $0x38] sm:$0xff] }
 0x193   : > { %584 = vst.msk [vmem:[#allocation6] sm:$0xff] %vm565_vm3, %v579_v52  ;;  %2383 = vmatprep.subr.bf16.mxu1 %v2710_v3  ;;  %v2282_v57 = vpack.c.bf16 %v707_v53, %v707_v53  ;;  %v2283_v62 = vpack.c.bf16 %v708_v58, %v708_v58 }
 0x195   : > { %2368 = vmatmul.mubr.msk.bf16.vlgmr.msra.gmra.mrb[8].mxu0 %vm565_vm3, %v2271_v54  ;;  %v1045_v61 = vsel %vm565_vm3, %v2282_v57, 0  ;;  %v1091_v2 = vsel %vm565_vm3, %v2283_v62, 0 }
 0x196   : > { %2378 = vmatpush3.bf16.xpose.msra.mxu0 %v999_v56  ;;  %2379 = vmatprep.mubr.msk.bf16.mxu0 %vm2711_vm1, %v2710_v3  ;;  %v675_v1 = vld [vmem:[#allocation4 + $0x30] sm:$0xff]  ;;  %v676_v9 = vld [vmem:[#allocation4 + $0x38] sm:$0xff] }
 0x197   : > { %2389 = vmatprep.subr.bf16.mxu0 %v2710_v3  ;;  %v2274_v7 = vpack.c.bf16 %v675_v1, %v675_v1  ;;  %v2275_v12 = vpack.c.bf16 %v676_v9, %v676_v9 }
 0x199   : > { %2374 = vmatmul.mubr.msk.bf16.vlgmr.msra.gmra.mrb[8].mxu1 %vm565_vm3, %v2272_v59 }
 0x19a   : > { %2384 = vmatpush3.bf16.xpose.msra.mxu1 %v1045_v61  ;;  %2385 = vmatprep.mubr.msk.bf16.mxu1 %vm2711_vm1, %v2710_v3  ;;  %v733_v63 = vld [vmem:[#allocation6] sm:$0xff] }
 0x19b   : > { %2395 = vmatprep.subr.bf16.mxu1 %v2710_v3  ;;  %v2284_v4 = vpack.c.bf16 %v733_v63, %v733_v63 }
 0x19d   : > { %2380 = vmatmul.mubr.msk.bf16.vlgmr.msra.gmra.mrb[12].mxu0 %vm565_vm3, %v2273_v0  ;;  %v1272_v10 = vsel %vm1270_vm4, %v2284_v4, 0 }
 0x19e   : > { %2390 = vmatpush3.bf16.xpose.msra.mxu0 %v1091_v2  ;;  %2391 = vmatprep.mubr.msk.bf16.mxu0 %vm2711_vm1, %v2710_v3 }
 0x19f   : > { %2401 = vmatprep.subr.bf16.mxu0 %v2710_v3 }
 0x1a1   : > { %2386 = vmatmul.mubr.msk.bf16.vlgmr.msra.gmra.mrb[12].mxu1 %vm565_vm3, %v2274_v7 }
 0x1a2   : > { %2396 = vmatpush3.bf16.msra.mxu1 %v1272_v10  ;;  %2397 = vmatprep.mubr.msk.bf16.mxu1 %vm2711_vm1, %v2710_v3 }
 0x1a3   : > { %2407 = vmatprep.subr.bf16.mxu1 %v2710_v3 }
 0x1a5   : > { %2392 = vmatmul.mubr.msk.bf16.vlgmr.msra.gmra.mrb[16].mxu0 %vm565_vm3, %v2275_v12 }
 0x1a6   : > { %2403 = vmatprep.mubr.msk.bf16.mxu0 %vm2711_vm1, %v2710_v3 }
 0x25c   : > { %v805_v14 = vpop.f32.mrb[0].mxu1 }
 0x25d   : > { %v2981_v15 = vadd.f32 %v2229_v13, %v805_v14  ;;  %v2351_v16 = vpop.f32.mrb[1].mxu1 }
 0x25e   : > { %v808_v17 = vpop.f32.mrb[2].mxu1 }
 0x25f   : > { %v2352_v19 = vpop.f32.mrb[3].mxu1  ;;  %v1155_v20 = vsel %vm565_vm3, %v2981_v15, -inf }
 0x260   : > { %1156 = vmax.xlane.f32.xlu0 %v1155_v20  ;;  %v851_v21 = vpop.f32.mrb[4].mxu0 }
 0x261   : > { %v1148_v22 = vadd.f32 %v2230_v18, %v851_v21  ;;  %v2357_v23 = vpop.f32.mrb[5].mxu0 }
 0x262   : > { %v854_v24 = vpop.f32.mrb[6].mxu0 }
 0x263   : > { %v2358_v25 = vpop.f32.mrb[7].mxu0  ;;  %v1158_v26 = vsel %vm565_vm3, %v1148_v22, -inf }
 0x264   : > { %v897_v27 = vpop.f32.mrb[4].mxu1  ;;  %1159 = vmax.xlane.f32.xlu1 %v1158_v26 }
 0x265   : > { %v1149_v28 = vadd.f32 %v2229_v13, %v897_v27  ;;  %v2363_v29 = vpop.f32.mrb[5].mxu1 }
 0x266   : > { %v900_v30 = vpop.f32.mrb[6].mxu1 }
 0x267   : > { %v2364_v31 = vpop.f32.mrb[7].mxu1  ;;  %v1161_v32 = vsel %vm565_vm3, %v1149_v28, -inf }
 0x268   : > { %1162 = vmax.xlane.f32.xlu0 %v1161_v32  ;;  %v943_v33 = vpop.f32.mrb[8].mxu0 }
 0x269   : > { %v1150_v34 = vadd.f32 %v2230_v18, %v943_v33  ;;  %v2369_v35 = vpop.f32.mrb[9].mxu0 }
 0x26a   : > { %v946_v36 = vpop.f32.mrb[10].mxu0 }
 0x26b   : > { %v2370_v37 = vpop.f32.mrb[11].mxu0  ;;  %v1164_v38 = vsel %vm565_vm3, %v1150_v34, -inf }
 0x26c   : > { %v989_v39 = vpop.f32.mrb[8].mxu1  ;;  %1165 = vmax.xlane.f32.xlu0 %v1164_v38 }
 0x26d   : > { %v1151_v40 = vadd.f32 %v2229_v13, %v989_v39  ;;  %v2375_v41 = vpop.f32.mrb[9].mxu1 }
 0x26e   : > { %v992_v42 = vpop.f32.mrb[10].mxu1 }
 0x26f   : > { %v2376_v43 = vpop.f32.mrb[11].mxu1  ;;  %v1167_v44 = vsel %vm565_vm3, %v1151_v40, -inf }
 0x270   : > { %1168 = vmax.xlane.f32.xlu1 %v1167_v44  ;;  %v1035_v45 = vpop.f32.mrb[12].mxu0 }
 0x271   : > { %v1152_v46 = vadd.f32 %v2230_v18, %v1035_v45  ;;  %v2381_v47 = vpop.f32.mrb[13].mxu0 }
 0x272   : > { %v1038_v48 = vpop.f32.mrb[14].mxu0 }
 0x273   : > { %v2382_v49 = vpop.f32.mrb[15].mxu0  ;;  %v1170_v50 = vsel %vm565_vm3, %v1152_v46, -inf }
 0x274   : > { %v1081_v51 = vpop.f32.mrb[12].mxu1  ;;  %1171 = vmax.xlane.f32.xlu0 %v1170_v50 }
 0x275   : > { %v2993_v52 = vadd.f32 %v2229_v13, %v1081_v51  ;;  %v2387_v53 = vpop.f32.mrb[13].mxu1 }
 0x276   : > { %v1084_v54 = vpop.f32.mrb[14].mxu1 }
 0x277   : > { %v2388_v55 = vpop.f32.mrb[15].mxu1  ;;  %v1173_v61 = vsel %vm565_vm3, %v2993_v52, -inf }
 0x278   : > { %v1127_v56 = vpop.f32.mrb[16].mxu0 }
 0x279   : > { %v2995_v57 = vadd.f32 %v2230_v18, %v1127_v56  ;;  %v2393_v58 = vpop.f32.mrb[17].mxu0 }
 0x27a   : > { %v1130_v59 = vpop.f32.mrb[18].mxu0 }
 0x27b   : > { %v2394_v60 = vpop.f32.mrb[19].mxu0  ;;  %v1176_v62 = vsel %vm565_vm3, %v2995_v57, -inf }
 0x281   : > { %606 = vrot.lane.b32.xlu1 %v2903_v8, %s2720_s9 }
 0x28a   : > { %580 = vrot.lane.b32.xlu0 %v2908_v11, %s2719_s29 }
 0x2a5   : > { %1174 = vmax.xlane.f32.xlu1 %v1173_v61 }
 0x2a9   : > { %1177 = vmax.xlane.f32.xlu0 %v1176_v62 }
 0x2b6   : > { %633 = vrot.lane.b32.xlu1 %v2903_v8, %s2721_s2 }
 0x2bf   : > { %608 = vrot.lane.b32.xlu0 %v2908_v11, %s2720_s9 }
 0x2ed   : > { %v1157_v63 = vpop.xlane.xlu0 %1156 }
 0x2ee   : > { %v1179_v0 = vsub.f32 %v2981_v15, %v1157_v63 }
 0x2f0   : > { %v1187_v1 = vmul.f32 1.442695, %v1179_v0 }
 0x2f1   : > { %v1160_v2 = vpop.xlane.xlu1 %1159 }
 0x2f2   : > { %2560 = vpow2.f32 %v1187_v1  ;;  %v1180_v4 = vsub.f32 %v1148_v22, %v1160_v2 }
 0x2f4   : > { %v1189_v7 = vmul.f32 1.442695, %v1180_v4 }
 0x2f5   : > { %v1163_v9 = vpop.xlane.xlu0 %1162 }
 0x2f6   : > { %2562 = vpow2.f32 %v1189_v7  ;;  %v1181_v10 = vsub.f32 %v1149_v28, %v1163_v9 }
 0x2f8   : > { %v1191_v12 = vmul.f32 1.442695, %v1181_v10 }
 0x2f9   : > { %v1166_v13 = vpop.xlane.xlu0 %1165 }
 0x2fa   : > { %2564 = vpow2.f32 %v1191_v12  ;;  %v1182_v14 = vsub.f32 %v1150_v34, %v1166_v13 }
 0x2fc   : > { %v3008_v16 = vpop.eup %2560  ;;  %v1193_v17 = vmul.f32 1.442695, %v1182_v14 }
 0x2fd   : > { %v1169_v18 = vpop.xlane.xlu1 %1168  ;;  %v1203_v19 = vsel %vm565_vm3, %v3008_v16, 0.0 }
 0x2fe   : > { %2566 = vpow2.f32 %v1193_v17  ;;  %v1183_v15 = vsub.f32 %v1151_v40, %v1169_v18  ;;  %1204 = vadd.xlane.f32.xlu1 %v1203_v19 }
 0x300   : > { %v3012_v20 = vpop.eup %2562  ;;  %v1195_v21 = vmul.f32 1.442695, %v1183_v15 }
 0x301   : > { %v607_v22 = vpop.permute.xlu1 %606  ;;  %v1172_v23 = vpop.xlane.xlu0 %1171  ;;  %v1206_v24 = vsel %vm565_vm3, %v3012_v20, 0.0 }
 0x302   : > { %2568 = vpow2.f32 %v1195_v21  ;;  %613 = vst.msk [vmem:[#allocation6 + $0x10] sm:$0xff] %vm565_vm3, %v607_v22  ;;  %v1184_v25 = vsub.f32 %v1152_v46, %v1172_v23  ;;  %1207 = vadd.xlane.f32.xlu0 %v1206_v24 }
 0x304   : > { %v3017_v26 = vpop.eup %2564  ;;  %v1197_v27 = vmul.f32 1.442695, %v1184_v25 }
 0x305   : > { %v581_v28 = vpop.permute.xlu0 %580  ;;  %v1209_v29 = vsel %vm565_vm3, %v3017_v26, 0.0 }
 0x306   : > { %2570 = vpow2.f32 %v1197_v27  ;;  %585 = vst.msk [vmem:[#allocation6 + $0x8] sm:$0xff] %vm565_vm3, %v581_v28  ;;  %1210 = vadd.xlane.f32.xlu1 %v1209_v29 }
 0x308   : > { %v3022_v30 = vpop.eup %2566 }
 0x309   : > { %v1212_v31 = vsel %vm565_vm3, %v3022_v30, 0.0  ;;  %v735_v54 = vld [vmem:[#allocation6 + $0x10] sm:$0xff] }
 0x30a   : > { %1213 = vadd.xlane.f32.xlu0 %v1212_v31  ;;  %v2286_v58 = vpack.c.bf16 %v735_v54, %v735_v54 }
 0x30c   : > { %v3026_v32 = vpop.eup %2568  ;;  %v1364_v61 = vsel %vm1270_vm4, %v2286_v58, 0 }
 0x30d   : > { %v1215_v33 = vsel %vm565_vm3, %v3026_v32, 0.0  ;;  %v734_v34 = vld [vmem:[#allocation6 + $0x8] sm:$0xff] }
 0x30e   : > { %1216 = vadd.xlane.f32.xlu1 %v1215_v33  ;;  %v2285_v35 = vpack.c.bf16 %v734_v34, %v734_v34 }
 0x310   : > { %v3030_v36 = vpop.eup %2570  ;;  %v1318_v37 = vsel %vm1270_vm4, %v2285_v35, 0 }
 0x311   : > { %2402 = vmatpush3.bf16.msra.mxu0 %v1318_v37  ;;  %v1218_v38 = vsel %vm565_vm3, %v3030_v36, 0.0 }
 0x312   : > { %1219 = vadd.xlane.f32.xlu0 %v1218_v38  ;;  %2413 = vmatprep.subr.bf16.mxu0 %v2710_v3 }
 0x332   : > { %v1175_v39 = vpop.xlane.xlu1 %1174 }
 0x333   : > { %v1185_v40 = vsub.f32 %v2993_v52, %v1175_v39 }
 0x335   : > { %v1199_v41 = vmul.f32 1.442695, %v1185_v40 }
 0x336   : > { %v634_v42 = vpop.permute.xlu1 %633  ;;  %v1178_v43 = vpop.xlane.xlu0 %1177 }
 0x337   : > { %2572 = vpow2.f32 %v1199_v41  ;;  %640 = vst.msk [vmem:[#allocation6 + $0x20] sm:$0xff] %vm565_vm3, %v634_v42  ;;  %v1186_v44 = vsub.f32 %v2995_v57, %v1178_v43 }
 0x339   : > { %v1201_v45 = vmul.f32 1.442695, %v1186_v44 }
 0x33a   : > { %v609_v46 = vpop.permute.xlu0 %608 }
 0x33b   : > { %2574 = vpow2.f32 %v1201_v45  ;;  %614 = vst.msk [vmem:[#allocation6 + $0x18] sm:$0xff] %vm565_vm3, %v609_v46 }
 0x33e   : > { %v737_v0 = vld [vmem:[#allocation6 + $0x20] sm:$0xff] }
 0x33f   : > { %v2288_v10 = vpack.c.bf16 %v737_v0, %v737_v0 }
 0x341   : > { %v3040_v47 = vpop.eup %2572 }
 0x342   : > { %v1221_v48 = vsel %vm565_vm3, %v3040_v47, 0.0 }
 0x343   : > { %1222 = vadd.xlane.f32.xlu1 %v1221_v48 }
 0x345   : > { %v3044_v49 = vpop.eup %2574 }
 0x346   : > { %v1224_v50 = vsel %vm565_vm3, %v3044_v49, 0.0 }
 0x347   : > { %1225 = vadd.xlane.f32.xlu0 %v1224_v50 }
 0x354   : > { %660 = vrot.lane.b32.xlu1 %v2903_v8, %s2722_s14  ;;  %v736_v8 = vld [vmem:[#allocation6 + $0x18] sm:$0xff] }
 0x355   : > { %v2287_v63 = vpack.c.bf16 %v736_v8, %v736_v8 }
 0x357   : > { %v1410_v7 = vsel %vm1270_vm4, %v2287_v63, 0 }
 0x358   : > { %662 = vrot.lane.b32.xlu1 %v2908_v11, %s2722_s14 }
 0x35d   : > { %635 = vrot.lane.b32.xlu0 %v2908_v11, %s2721_s2 }
 0x38b   : > { %v1205_v51 = vpop.xlane.xlu1 %1204 }
 0x38c   : > { %2576 = vrcp.f32 %v1205_v51 }
 0x38f   : > { %v1208_v52 = vpop.xlane.xlu0 %1207 }
 0x390   : > { %2578 = vrcp.f32 %v1208_v52 }
 0x393   : > { %v1211_v53 = vpop.xlane.xlu1 %1210 }
 0x394   : > { %2580 = vrcp.f32 %v1211_v53 }
 0x396   : > { %v2577_v55 = vpop.eup %2576 }
 0x397   : > { %v1243_v56 = vmul.f32 %v2577_v55, %v3008_v16  ;;  %v1214_v57 = vpop.xlane.xlu0 %1213  ;;  %v1456_v16 = vsel %vm1270_vm4, %v2288_v10, 0 }
 0x398   : > { %2582 = vrcp.f32 %v1214_v57 }
 0x399   : > { %1251 = vst.msk [vmem:[%s2877_s21] sm:$0xff] %vm565_vm3, %v1243_v56  ;;  %v1259_v59 = vpack.c.bf16 %v1243_v56, %v1243_v56 }
 0x39a   : > { %v2579_v60 = vpop.eup %2578 }
 0x39b   : > { %v1244_v11 = vmul.f32 %v2579_v60, %v3012_v20  ;;  %2398 = vmatmul.mubr.msk.bf16.vlgmr.msra.gmra.mrb[16].mxu1 %vm565_vm3, %v1259_v59  ;;  %v1217_v62 = vpop.xlane.xlu1 %1216 }
 0x39c   : > { %2408 = vmatpush3.bf16.msra.mxu1 %v1364_v61  ;;  %2584 = vrcp.f32 %v1217_v62  ;;  %2409 = vmatprep.mubr.msk.bf16.mxu1 %vm2711_vm1, %v2710_v3  ;;  %v2552_v62 = vld [vmem:[%s2855_s17] sm:$0xff]  }
 0x39d   : > { %1252 = vst.msk [vmem:[%s2877_s21 + $0x8] sm:$0xff] %vm565_vm3, %v1244_v11  ;;  %v1260_v1 = vpack.c.bf16 %v1244_v11, %v1244_v11  ;;  %2419 = vmatprep.subr.bf16.mxu1 %v2710_v3 }
 0x39e   : > { %v2581_v2 = vpop.eup %2580 }
 0x39f   : > { %v1245_v4 = vmul.f32 %v2581_v2, %v3017_v26  ;;  %2404 = vmatmul.mubr.msk.bf16.vlgmr.msra.gmra.mrb[20].mxu0 %vm565_vm3, %v1260_v1  ;;  %v1220_v9 = vpop.xlane.xlu0 %1219  ;;  %v2553_v1 = vld [vmem:[%s2855_s17 + $0x8] sm:$0xff]  }
 0x3a0   : > { %2414 = vmatpush3.bf16.msra.mxu0 %v1410_v7  ;;  %2586 = vrcp.f32 %v1220_v9  ;;  %2415 = vmatprep.mubr.msk.bf16.mxu0 %vm2711_vm1, %v2710_v3 }
 0x3a1   : > { %1253 = vst.msk [vmem:[%s2877_s21 + $0x10] sm:$0xff] %vm565_vm3, %v1245_v4  ;;  %v1261_v12 = vpack.c.bf16 %v1245_v4, %v1245_v4  ;;  %2425 = vmatprep.subr.bf16.mxu0 %v2710_v3 }
 0x3a2   : > { %v2583_v13 = vpop.eup %2582 }
 0x3a3   : > { %v1246_v14 = vmul.f32 %v2583_v13, %v3022_v30  ;;  %2410 = vmatmul.mubr.msk.bf16.vlgmr.msra.gmra.mrb[20].mxu1 %vm565_vm3, %v1261_v12 }
 0x3a4   : > { %2420 = vmatpush3.bf16.msra.mxu1 %v1456_v16  ;;  %2421 = vmatprep.mubr.msk.bf16.mxu1 %vm2711_vm1, %v2710_v3 }
 0x3a5   : > { %1254 = vst.msk [vmem:[%s2877_s21 + $0x18] sm:$0xff] %vm565_vm3, %v1246_v14  ;;  %v1262_v17 = vpack.c.bf16 %v1246_v14, %v1246_v14  ;;  %2431 = vmatprep.subr.bf16.mxu1 %v2710_v3 }
 0x3a6   : > { %v2585_v18 = vpop.eup %2584 }
 0x3a7   : > { %v1247_v19 = vmul.f32 %v2585_v18, %v3026_v32  ;;  %2416 = vmatmul.mubr.msk.bf16.vlgmr.msra.gmra.mrb[24].mxu0 %vm565_vm3, %v1262_v17 }
 0x3a8   : > { %2427 = vmatprep.mubr.msk.bf16.mxu0 %vm2711_vm1, %v2710_v3 }
 0x3a9   : > { %1255 = vst.msk [vmem:[%s2877_s21 + $0x20] sm:$0xff] %vm565_vm3, %v1247_v19  ;;  %v1263_v15 = vpack.c.bf16 %v1247_v19, %v1247_v19 }
 0x3aa   : > { %v2587_v20 = vpop.eup %2586 }
 0x3ab   : > { %v1248_v21 = vmul.f32 %v2587_v20, %v3030_v36  ;;  %2422 = vmatmul.mubr.msk.bf16.vlgmr.msra.gmra.mrb[24].mxu1 %vm565_vm3, %v1263_v15 }
 0x3ac   : > { %2433 = vmatprep.mubr.msk.bf16.mxu1 %vm2711_vm1, %v2710_v3 }
 0x3ad   : > { %1256 = vst.msk [vmem:[%s2877_s21 + $0x28] sm:$0xff] %vm565_vm3, %v1248_v21  ;;  %v1264_v40 = vpack.c.bf16 %v1248_v21, %v1248_v21 }
 0x3d0   : > { %v1223_v22 = vpop.xlane.xlu1 %1222 }
 0x3d1   : > { %2588 = vrcp.f32 %v1223_v22 }
 0x3d4   : > { %v661_v23 = vpop.permute.xlu1 %660  ;;  %v1226_v24 = vpop.xlane.xlu0 %1225 }
 0x3d5   : > { %667 = vst.msk [vmem:[#allocation6 + $0x30] sm:$0xff] %vm565_vm3, %v661_v23  ;;  %2590 = vrcp.f32 %v1226_v24 }
 0x3d8   : > { %v663_v25 = vpop.permute.xlu1 %662  ;;  %v636_v26 = vpop.permute.xlu0 %635 }
 0x3d9   : > { %668 = vst.msk [vmem:[#allocation6 + $0x38] sm:$0xff] %vm565_vm3, %v663_v25  ;;  %641 = vst.msk [vmem:[#allocation6 + $0x28] sm:$0xff] %vm565_vm3, %v636_v26 }
 0x3db   : > { %v2589_v27 = vpop.eup %2588 }
 0x3dc   : > { %v1249_v28 = vmul.f32 %v2589_v27, %v3040_v47  ;;  %v739_v29 = vld [vmem:[#allocation6 + $0x30] sm:$0xff] }
 0x3dd   : > { %v2290_v30 = vpack.c.bf16 %v739_v29, %v739_v29 }
 0x3de   : > { %1257 = vst.msk [vmem:[%s2877_s21 + $0x30] sm:$0xff] %vm565_vm3, %v1249_v28  ;;  %v1265_v36 = vpack.c.bf16 %v1249_v28, %v1249_v28 }
 0x3df   : > { %v2591_v31 = vpop.eup %2590  ;;  %v1548_v32 = vsel %vm1270_vm4, %v2290_v30, 0 }
 0x3e0   : > { %v1250_v33 = vmul.f32 %v2591_v31, %v3044_v49  ;;  %2432 = vmatpush3.bf16.msra.mxu1 %v1548_v32  ;;  %v738_v34 = vld [vmem:[#allocation6 + $0x28] sm:$0xff]  ;;  %v740_v35 = vld [vmem:[#allocation6 + $0x38] sm:$0xff] }
 0x3e1   : > { %v2289_v37 = vpack.c.bf16 %v738_v34, %v738_v34  ;;  %2443 = vmatprep.subr.bf16.mxu1 %v2710_v3  ;;  %v2291_v39 = vpack.c.bf16 %v740_v35, %v740_v35 }
 0x3e2   : > { %1258 = vst.msk [vmem:[%s2877_s21 + $0x38] sm:$0xff] %vm565_vm3, %v1250_v33  ;;  %v1266_v42 = vpack.c.bf16 %v1250_v33, %v1250_v33 }
 0x3e3   : > { %2434 = vmatmul.mubr.msk.bf16.vlgmr.msra.gmra.mrb[28].mxu1 %vm565_vm3, %v1265_v36  ;;  %v1502_v38 = vsel %vm1270_vm4, %v2289_v37, 0  ;;  %v1594_v41 = vsel %vm1270_vm4, %v2291_v39, 0 }
 0x3e4   : > { %2426 = vmatpush3.bf16.msra.mxu0 %v1502_v38  ;;  %2447 = vmatprep.mubr.msk.bf16.mxu1 %vm2711_vm1, %v2710_v3 }
 0x3e5   : > { %2437 = vmatprep.subr.bf16.mxu0 %v2710_v3  ;;  %2444 = vmatpush3.bf16.msra.mxu1 %v2552_v62  ;;  %v2244_v62 = vld [vmem:[%s470_s30] ss:$0 sm:$0xff] }
 0x3e6   : > { %2445 = vmatprep.subr.bf16.mxu1 %v2710_v3 }
 0x3e7   : > { %2428 = vmatmul.mubr.msk.bf16.vlgmr.msra.gmra.mrb[28].mxu0 %vm565_vm3, %v1264_v40 }
 0x3e8   : > { %2438 = vmatpush3.bf16.msra.mxu0 %v1594_v41  ;;  %2439 = vmatprep.mubr.msk.bf16.mxu0 %vm2711_vm1, %v2710_v3  ;;  %v2554_v41 = vld [vmem:[%s2869_s20] sm:$0xff]  }
 0x3e9   : > { %2451 = vmatprep.subr.bf16.mxu0 %v2710_v3  ;;  %2446 = vmatpush3.bf16.msra.mxu1 %v2553_v1 }
 0x3ea   : > { %2459 = vmatprep.subr.bf16.mxu1 %v2710_v3 }
 0x3ef   : > { %2440 = vmatmul.mubr.msk.bf16.vlgmr.msra.gmra.mrb[32].mxu0 %vm565_vm3, %v1266_v42  ;;  %v2555_v42 = vld [vmem:[%s2869_s20 + $0x8] sm:$0xff]  }
 0x3f0   : > { %2455 = vmatprep.mubr.msk.bf16.mxu0 %vm2711_vm1, %v2710_v3  ;;  %2452 = vmatpush3.bf16.msra.mxu0 %v2554_v41  ;;  %v2255_v41 = vld [vmem:[%s2860_s24 + $0x3] ss:$0 sm:$0xff] }
 0x3f1   : > { %2453 = vmatprep.subr.bf16.mxu0 %v2710_v3 }
 0x3f4   : > { %2454 = vmatpush3.bf16.msra.mxu0 %v2555_v42 }
 0x46e   : > { %v1308_v43 = vpop.f32.mrb[16].mxu1 }
 0x46f   : > { %1636 = vst.msk [vmem:[#allocation3] sm:$0xff] %vm565_vm3, %v1308_v43  ;;  %v2399_v44 = vpop.f32.mrb[17].mxu1  ;;  %v2556_v43 = vld [vmem:[%s2875_s18] sm:$0xff]  }
 0x470   : > { %v1311_v45 = vpop.f32.mrb[18].mxu1  ;;  %v2557_v44 = vld [vmem:[%s2875_s18 + $0x8] sm:$0xff]  }
 0x471   : > { %v2400_v46 = vpop.f32.mrb[19].mxu1 }
 0x472   : > { %v1354_v47 = vpop.f32.mrb[20].mxu0 }
 0x473   : > { %1637 = vst.msk [vmem:[#allocation3 + $0x8] sm:$0xff] %vm565_vm3, %v1354_v47  ;;  %v2405_v48 = vpop.f32.mrb[21].mxu0 }
 0x474   : > { %v1357_v49 = vpop.f32.mrb[22].mxu0 }
 0x475   : > { %v2406_v50 = vpop.f32.mrb[23].mxu0 }
 0x476   : > { %v1400_v51 = vpop.f32.mrb[20].mxu1 }
 0x477   : > { %v2411_v52 = vpop.f32.mrb[21].mxu1  ;;  %1640 = vrot.lane.b32.xlu0 %v1400_v51, %s2723_s22 }
 0x478   : > { %v1403_v53 = vpop.f32.mrb[22].mxu1 }
 0x479   : > { %v2412_v54 = vpop.f32.mrb[23].mxu1  ;;  %v2242_v53 = vld [vmem:[%s2860_s24] ss:$0 sm:$0xff] }
 0x47a   : > { %v1446_v55 = vpop.f32.mrb[24].mxu0 }
 0x47b   : > { %1642 = vrot.lane.b32.xlu1 %v1446_v55, %s2723_s22  ;;  %v2417_v56 = vpop.f32.mrb[25].mxu0 }
 0x47c   : > { %v1449_v57 = vpop.f32.mrb[26].mxu0 }
 0x47d   : > { %v2418_v58 = vpop.f32.mrb[27].mxu0  ;;  %v2243_v57 = vld [vmem:[%s2860_s24 + $0x1] ss:$0 sm:$0xff] }
 0x47e   : > { %v1492_v8 = vpop.f32.mrb[24].mxu1 }
 0x47f   : > { %v2423_v59 = vpop.f32.mrb[25].mxu1  ;;  %1651 = vrot.lane.b32.xlu0 %v1492_v8, %s2724_s25 }
 0x480   : > { %v1495_v60 = vpop.f32.mrb[26].mxu1 }
 0x481   : > { %v2424_v11 = vpop.f32.mrb[27].mxu1 }
 0x482   : > { %v2558_v11 = vld [vmem:[%s2875_s18 + $0x10] sm:$0xff]  }
 0x4b6   : > { %v1584_v61 = vpop.f32.mrb[28].mxu1 }
 0x4b7   : > { %v2435_v63 = vpop.f32.mrb[29].mxu1  ;;  %1662 = vrot.lane.b32.xlu0 %v1584_v61, %s2725_s27  ;;  %v2559_v61 = vld [vmem:[%s2875_s18 + $0x18] sm:$0xff]  }
 0x4b8   : > { %v1587_v0 = vpop.f32.mrb[30].mxu1 }
 0x4b9   : > { %v2436_v2 = vpop.f32.mrb[31].mxu1 }
 0x4ba   : > { %v1538_v4 = vpop.f32.mrb[28].mxu0 }
 0x4bb   : > { %1653 = vrot.lane.b32.xlu1 %v1538_v4, %s2724_s25  ;;  %v2429_v7 = vpop.f32.mrb[29].mxu0 }
 0x4bc   : > { %v1541_v9 = vpop.f32.mrb[30].mxu0 }
 0x4bd   : > { %v2430_v10 = vpop.f32.mrb[31].mxu0 }
 0x4c2   : > { %v1630_v12 = vpop.f32.mrb[32].mxu0 }
 0x4c3   : > { %1664 = vrot.lane.b32.xlu1 %v1630_v12, %s2725_s27  ;;  %v2441_v13 = vpop.f32.mrb[33].mxu0 }
 0x4c4   : > { %v1633_v14 = vpop.f32.mrb[34].mxu0  ;;  %v2248_v13 = vld [vmem:[%s2860_s24 + $0x4] ss:$0 sm:$0xff] }
 0x4c5   : > { %v2442_v16 = vpop.f32.mrb[35].mxu0 }
 0x4e9   : > { %v1641_v17 = vpop.permute.xlu0 %1640 }
 0x4ea   : > { %1647 = vst.msk [vmem:[#allocation3] sm:$0xff] %vm1646_vm5, %v1641_v17 }
 0x4ed   : > { %v1643_v18 = vpop.permute.xlu1 %1642 }
 0x4ee   : > { %1648 = vst.msk [vmem:[#allocation3 + $0x8] sm:$0xff] %vm1646_vm5, %v1643_v18 }
 0x4f1   : > { %v1652_v19 = vpop.permute.xlu0 %1651 }
 0x4f2   : > { %1658 = vst.msk [vmem:[#allocation3] sm:$0xff] %vm1657_vm6, %v1652_v19 }
 0x529   : > { %v1663_v15 = vpop.permute.xlu0 %1662 }
 0x52a   : > { %1669 = vst.msk [vmem:[#allocation3] sm:$0xff] %vm1668_vm7, %v1663_v15 }
 0x52d   : > { %v1654_v20 = vpop.permute.xlu1 %1653 }
 0x52e   : > { %1659 = vst.msk [vmem:[#allocation3 + $0x8] sm:$0xff] %vm1657_vm6, %v1654_v20 }
 0x531   : > { %v1671_v22 = vld [vmem:[#allocation3] sm:$0xff] }
 0x535   : > { %v1665_v21 = vpop.permute.xlu1 %1664 }
 0x536   : > { %1670 = vst.msk [vmem:[#allocation3 + $0x8] sm:$0xff] %vm1668_vm7, %v1665_v21 }
 0x53d   : > { %v1672_v23 = vld [vmem:[#allocation3 + $0x8] sm:$0xff] }
 0x53e   : > { %v1673_v24 = vpack.c.bf16 %v1672_v23, %v1671_v22 }
 0x540   : > { %2448 = vmatmul.mubr.msk.bf16.vlgmr.msra.gmra.mrb[32].mxu1 %vm518_vm2, %v1673_v24 }
 0x541   : > { %2467 = vmatprep.mubr.msk.bf16.mxu1 %vm2711_vm1, %v2710_v3  ;;  %2460 = vmatpush3.bf16.msra.mxu1 %v2556_v43 }
 0x542   : > { %2461 = vmatprep.subr.bf16.mxu1 %v2710_v3 }
 0x545   : > { %2462 = vmatpush3.bf16.msra.mxu1 %v2557_v44 }
 0x546   : > { %2463 = vmatprep.subr.bf16.mxu1 %v2710_v3 }
 0x549   : > { %2464 = vmatpush3.bf16.msra.mxu1 %v2558_v11 }
 0x54a   : > { %2465 = vmatprep.subr.bf16.mxu1 %v2710_v3 }
 0x54d   : > { %2466 = vmatpush3.bf16.msra.mxu1 %v2559_v61 }
 0x613   : > { %v1727_v25 = vpop.f32.mrb[32].mxu1 }
 0x614   : > { %v1728_v26 = vadd.f32 %v1727_v25, %v2890_v5  ;;  %v2449_v27 = vpop.f32.mrb[33].mxu1 }
 0x615   : > { %v1730_v28 = vpop.f32.mrb[34].mxu1 }
 0x616   : > { %v1731_v29 = vadd.f32 %v1730_v28, %v2892_v6  ;;  %v2450_v30 = vpop.f32.mrb[35].mxu1  ;;  %v1734_v31 = vsel %vm518_vm2, %v1728_v26, 0.0 }
 0x617   : > { %1735 = vadd.xlane.f32.xlu0 %v1734_v31 }
 0x618   : > { %v1737_v32 = vsel %vm518_vm2, %v1731_v29, 0.0 }
 0x619   : > { %1738 = vadd.xlane.f32.xlu1 %v1737_v32 }
 0x6a4   : > { %v1736_v33 = vpop.xlane.xlu0 %1735 }
 0x6a5   : > { %v1741_v34 = vmul.f32 0.03125, %v1736_v33 }
 0x6a6   : > { %v1739_v35 = vpop.xlane.xlu1 %1738 }
 0x6a7   : > { %v1743_v36 = vsub.f32 %v1728_v26, %v1741_v34  ;;  %v1742_v5 = vmul.f32 0.03125, %v1739_v35 }
 0x6a9   : > { %v1744_v37 = vsub.f32 %v1731_v29, %v1742_v5  ;;  %v1745_v38 = vmul.f32 %v1743_v36, %v1743_v36 }
 0x6ab   : > { %v1747_v6 = vsel %vm518_vm2, %v1745_v38, 0.0  ;;  %v1746_v39 = vmul.f32 %v1744_v37, %v1744_v37 }
 0x6ac   : > { %1748 = vadd.xlane.f32.xlu0 %v1747_v6  ;;  %v2254_v6 = vld [vmem:[%s2860_s24 + $0x2] ss:$0 sm:$0xff] }
 0x6ad   : > { %v1750_v40 = vsel %vm518_vm2, %v1746_v39, 0.0 }
 0x6b0   : > { %1751 = vadd.xlane.f32.xlu0 %v1750_v40 }
 0x739   : > { %v1749_v45 = vpop.xlane.xlu0 %1748 }
 0x73a   : > { %v1753_v46 = vmul.f32 0.03125, %v1749_v45 }
 0x73c   : > { %v1755_v47 = vadd.f32 1e-12, %v1753_v46 }
 0x73d   : > { %v1752_v48 = vpop.xlane.xlu0 %1751 }
 0x73e   : > { %2592 = vrsqrt.f32 %v1755_v47  ;;  %v1754_v49 = vmul.f32 0.03125, %v1752_v48 }
 0x740   : > { %v1756_v50 = vadd.f32 1e-12, %v1754_v49 }
 0x742   : > { %2594 = vrsqrt.f32 %v1756_v50 }
 0x748   : > { %v2593_v51 = vpop.eup %2592 }
 0x749   : > { %v1759_v52 = vmul.f32 %v2593_v51, %v1743_v36 }
 0x74b   : > { %v1765_v55 = vmul.f32 %v2242_v53, %v1759_v52 }
 0x74c   : > { %v2595_v54 = vpop.eup %2594 }
 0x74d   : > { %v1760_v56 = vmul.f32 %v2595_v54, %v1744_v37  ;;  %v1771_v8 = vadd.f32 %v2243_v57, %v1765_v55 }
 0x74f   : > { %v1766_v58 = vmul.f32 %v2242_v53, %v1760_v56 }
 0x751   : > { %v1772_v59 = vadd.f32 %v2243_v57, %v1766_v58 }
 0x753   : > { %v1773_v60 = vpack.c.bf16 %v1772_v59, %v1771_v8 }
 0x755   : > { %2456 = vmatmul.mubr.msk.bf16.vlgmr.msra.gmra.mrb[36].mxu0 %vm518_vm2, %v1773_v60 }
 0x828   : > { %v1833_v63 = vpop.f32.mrb[36].mxu0 }
 0x829   : > { %v1834_v0 = vadd.f32 %v2244_v62, %v1833_v63  ;;  %v2457_v1 = vpop.f32.mrb[37].mxu0 }
 0x82a   : > { %v1836_v2 = vpop.f32.mrb[38].mxu0 }
 0x82b   : > { %v1837_v4 = vadd.f32 %v2244_v62, %v1836_v2  ;;  %v2458_v7 = vpop.f32.mrb[39].mxu0  ;;  %v1840_v9 = vmax.f32 %v1834_v0, 0.0 }
 0x82d   : > { %v1841_v10 = vmax.f32 %v1837_v4, 0.0 }
 0x82f   : > { %v1842_v12 = vpack.c.bf16 %v1841_v10, %v1840_v9 }
 0x831   : > { %2468 = vmatmul.mubr.msk.bf16.vlgmr.msra.gmra.mrb[36].mxu1 %vm1879_vm8, %v1842_v12 }
 0x904   : > { %v1917_v3 = vpop.f32.mrb[36].mxu1 }
 0x905   : > { %v1918_v14 = vadd.f32 %v2248_v13, %v1917_v3  ;;  %v2469_v16 = vpop.f32.mrb[37].mxu1 }
 0x906   : > { %v1920_v17 = vpop.f32.mrb[38].mxu1 }
 0x907   : > { %v1921_v18 = vadd.f32 %v2248_v13, %v1920_v17  ;;  %v2470_v19 = vpop.f32.mrb[39].mxu1  ;;  %v1924_v15 = vadd.f32 %v1918_v14, %v1771_v8 }
 0x909   : > { %v1926_v20 = vsel %vm518_vm2, %v1924_v15, 0.0  ;;  %v1925_v21 = vadd.f32 %v1921_v18, %v1772_v59 }
 0x90a   : > { %1927 = vadd.xlane.f32.xlu1 %v1926_v20 }
 0x90b   : > { %v1929_v22 = vsel %vm518_vm2, %v1925_v21, 0.0 }
 0x90c   : > { %1930 = vadd.xlane.f32.xlu0 %v1929_v22 }
 0x997   : > { %v1928_v23 = vpop.xlane.xlu1 %1927 }
 0x998   : > { %v1932_v24 = vmul.f32 0.03125, %v1928_v23 }
 0x999   : > { %v1931_v25 = vpop.xlane.xlu0 %1930 }
 0x99a   : > { %v1934_v26 = vsub.f32 %v1924_v15, %v1932_v24  ;;  %v1933_v27 = vmul.f32 0.03125, %v1931_v25 }
 0x99c   : > { %v1935_v28 = vsub.f32 %v1925_v21, %v1933_v27  ;;  %v1936_v29 = vmul.f32 %v1934_v26, %v1934_v26 }
 0x99e   : > { %v1938_v30 = vsel %vm518_vm2, %v1936_v29, 0.0  ;;  %v1937_v31 = vmul.f32 %v1935_v28, %v1935_v28 }
 0x99f   : > { %1939 = vadd.xlane.f32.xlu1 %v1938_v30 }
 0x9a0   : > { %v1941_v32 = vsel %vm518_vm2, %v1937_v31, 0.0 }
 0x9a1   : > { %1942 = vadd.xlane.f32.xlu0 %v1941_v32 }
 0xa2c   : > { %v1940_v33 = vpop.xlane.xlu1 %1939 }
 0xa2d   : > { %v1944_v34 = vmul.f32 0.03125, %v1940_v33 }
 0xa2e   : > { %v1943_v35 = vpop.xlane.xlu0 %1942 }
 0xa2f   : > { %v1946_v36 = vadd.f32 1e-12, %v1944_v34  ;;  %v1945_v5 = vmul.f32 0.03125, %v1943_v35 }
 0xa31   : > { %2596 = vrsqrt.f32 %v1946_v36  ;;  %v1947_v37 = vadd.f32 1e-12, %v1945_v5 }
 0xa33   : > { %2598 = vrsqrt.f32 %v1947_v37 }
 0xa3b   : > { %v2597_v38 = vpop.eup %2596 }
 0xa3c   : > { %v1950_v39 = vmul.f32 %v2597_v38, %v1934_v26 }
 0xa3d   : > { %v2599_v40 = vpop.eup %2598 }
 0xa3e   : > { %v1956_v42 = vmul.f32 %v2254_v6, %v1950_v39  ;;  %v1951_v43 = vmul.f32 %v2599_v40, %v1935_v28  ;;  %1969 = sbr.rel (%p2256_p13) target bundleno = 2629 (0xa45), region = 60 }
 0xa40   : > { %v1962_v44 = vadd.f32 %v2255_v41, %v1956_v42  ;;  %v1957_v45 = vmul.f32 %v2254_v6, %v1951_v43 }
 0xa42   : > { %1964 = vst.msk [vmem:[#allocation2] sm:$0xff] %vm518_vm2, %v1962_v44  ;;  %v1963_v46 = vadd.f32 %v2255_v41, %v1957_v45  ;;  %1970 = vst.msk [vmem:[#allocation7] sm:$0xff] (!%p2256_p13), %vm518_vm2, %v1962_v44 }
 0xa44   : > { %1965 = vst.msk [vmem:[#allocation2 + $0x8] sm:$0xff] %vm518_vm2, %v1963_v46  ;;  %1971 = vst.msk [vmem:[#allocation7 + $0x8] sm:$0xff] (!%p2256_p13), %vm518_vm2, %v1963_v46 }
 0xa45 PF: > { %s2726_s30 = smov [#allocation7]  }
 0xa46   : > { %s1986_s24 = sshll.u32 %s2726_s30, 4  ;;  %s1987_s24 = int_to_ptr.vmem [resolvable:$true] %s1986_s24 }
 0xa47   : > { %s2600_s26 = scalar_lea.vmem %s1987_s24, 256  ;;  %p2607_p5 = scmp.lt.s32.totalorder %s1987_s24, %s1987_s24 }
 0xa48   : > { %p2601_p0 = scmp.ne.s32.totalorder %s1987_s24, %s2600_s26  ;;  %p2608_p6 = scmp.lt.s32.totalorder %s2600_s26, %s2600_s26 }
 0xa4a   : > { %p2602_p1 = pnand %p2601_p0, %p2815_p2  ;;  %p2609_p7 = por %p2608_p6, %p2607_p5 }
 0xa4c   : > { %p2603_p3 = pneg %p2602_p1 }
 0xa4e   : > { %p2610_p9 = pnand %p2609_p7, %p2603_p3 }
 0xa50   : > { %2613 = shalt.err (!%p2610_p9)
}
 0xa51   : > { %s2614_s16 = scalar_lea.hbm %s3255_s8, 256 }
 0xa52   : > { %p2615_p10 = scmp.ne.s32.totalorder %s3255_s8, %s2614_s16  ;;  %p2620_p13 = scmp.lt.u32.totalorder %s2614_s16, %s3255_s8 }
 0xa54   : > { %p2616_p11 = pnand %p2615_p10, %p2815_p2 }
 0xa56   : > { %p2617_p12 = pneg %p2616_p11 }
 0xa58   : > { %p2622_p0 = pnand %p2620_p13, %p2617_p12 }
 0xa5a   : > { %2625 = shalt.err (!%p2622_p0)
}
 0xa5b   : > { %s2727_s11 = smov 128   ;;  %s2292_s25 = sshll.u32 %s2700_s12, 10 }
 0xa5c   : > { %2472 = dma.vmem_to_hbm [thread:$0]  (%p2815_p2), %s1987_s24, 256, %s3255_s8, [#allocation8], %s2727_s11, %s2727_s11, %s2723_s22  }
 0xa5d   : > { %s2004_s27 = sshll.u32 %s2877_s21, 4  ;;  %s3283_s30 = sld [smem:[#allocation22_spill]]  ;;  %s3190_s27 = int_to_ptr.vmem [resolvable:$true] %s2004_s27 }
 0xa5e   : > { %s3285_s28 = sand.u32 1, %s2692_s10   ;;  %s2626_s29 = scalar_lea.vmem %s3190_s27, 1024 }
 0xa5f   : > { %s3194_s16 = scalar_lea.sflag [#allocation10], %s3285_s28  ;;  %p2627_p1 = scmp.ne.s32.totalorder %s3190_s27, %s2626_s29 }
 0xa60   : > { %s2728_s12 = smov [#allocation9]  }
 0xa61   : > { %p2628_p3 = pnand %p2627_p1, %p2825_p4  ;;  %s2630_s21 = sshll.u32 %s2728_s12, 4  ;;  %s2631_s21 = int_to_ptr.vmem [resolvable:$false] %s2630_s21 }
 0xa62   : > { %s2632_s24 = scalar_lea.vmem %s2631_s21, 2048  ;;  %p2633_p6 = scmp.lt.s32.totalorder %s3190_s27, %s2631_s21 }
 0xa63   : > { %s3284_s26 = smov %s3283_s30  ;;  %s3188_s18 = scalar_lea.hbm %s3283_s30, %s2292_s25 }
 0xa64   : > { %p2629_p5 = pneg %p2628_p3  ;;  %p2634_p7 = scmp.lt.s32.totalorder %s2632_s24, %s2626_s29 }
 0xa66   : > { %p2635_p9 = por %p2634_p7, %p2633_p6 }
 0xa68   : > { %p2636_p10 = pnand %p2635_p9, %p2629_p5 }
 0xa6a   : > { %2639 = shalt.err (!%p2636_p10)
}
 0xa6b   : > { %s2640_s15 = scalar_lea.hbm %s3188_s18, 1024  ;;  %s2644_s9 = scalar_lea.hbm %s3284_s26, 2048 }
 0xa6c   : > { %p2641_p11 = scmp.ne.s32.totalorder %s3188_s18, %s2640_s15  ;;  %p2645_p0 = scmp.lt.u32.totalorder %s3188_s18, %s3284_s26 }
 0xa6d   : > { %p2646_p1 = scmp.lt.u32.totalorder %s2644_s9, %s2640_s15  ;;  %p2648_p5 = scmp.lt.u32.totalorder %s2640_s15, %s3188_s18 }
 0xa6e   : > { %p2642_p12 = pnand %p2641_p11, %p2825_p4 }
 0xa6f   : > { %p2647_p3 = por %p2646_p1, %p2645_p0 }
 0xa70   : > { %p2643_p13 = pneg %p2642_p12 }
 0xa71   : > { %p2649_p6 = por %p2648_p5, %p2647_p3 }
 0xa73   : > { %p2650_p7 = pnand %p2649_p6, %p2643_p13 }
 0xa75   : > { %2653 = shalt.err (!%p2650_p7)
}
 0xa76   : > { %2473 = dma.vmem_to_hbm [thread:$0]  (%p2825_p4), %s3190_s27, 1024, %s3188_s18, %s3194_s16, %s2727_s11, %s2727_s11, %s2723_s22  }
 0xa77   : > { %2679 = dma.done.wait (%p2815_p2), [#allocation8], 256  }
 0xa78   : > { %2681 = vsyncadd (%p2815_p2), [#allocation8], 4294967040 }
 0xa79 PF: > { %s3286_s17 = sld [smem:[#allocation16_spill]]  ;;  %s3287_s20 = sld [smem:[#allocation13_spill]] }
 0xa7f   : > { %p2483_p9 = scmp.ge.s32.totalorder %s3286_s17, 2  ;;  %s2023_s28 = sand.u32 1, %s3287_s20  }
 0xa80   : > { %s2024_s14 = scalar_lea.sflag [#allocation10], %s2023_s28 }
 0xa81   : > { %p2478_p10 = pnand %p2483_p9, %p2832_p8 }
 0xa83   : > { %2683 = dma.done.wait (!%p2478_p10), %s2024_s14, 1024  }
 0xa84   : > { %2685 = vsyncadd (!%p2478_p10), %s2024_s14, 4294966272  ;;  %s24_s14 = sadd.s32 1, %s3286_s17   ;;  %s3289_s22 = sld [smem:[#allocation14_spill]] }
 0xa85   : > { %p21_p11 = scmp.ge.s32.totalorder %s24_s14, 4   ;;  %s3290_s11 = sld [smem:[#allocation20_spill]] }
 0xa86   : > { %s3291_s12 = sld [smem:[#allocation15_spill]]  ;;  %s3292_s13 = sld [smem:[#allocation17_spill]] }
 0xa87   : > { %s3293_s30 = smov %s2692_s10  ;;  %23 = sbr.rel (!%p21_p11) target bundleno = 8 (0x8), region = 135 }
 0xa8a   : > { %s3294_s10 = smov %s3289_s22 }
 0xa8e   :  { %2029 = vsyncpa [#allocation8], 1 }
 0xa8f   :  { %2031 = vsyncpa [#allocation8 + $0x1], 1 }
 0xa90   :  { %2032 = vsyncpa [#allocation10], 1 }
 0xa91   :  { %2034 = vsyncpa [#allocation10 + $0x1], 1 }

</bundles_post_ra>
